<compile_context>
chip_gen: v6e
topology: v6e:2x2x1
jax: 0.10.0
libtpu: 0.0.40
codegen_flags: <defaults>
</compile_context>

<pallas_src>
import math
from functools import partial

import jax
import jax.numpy as jnp
from jax.experimental import pallas as pl
from jax.experimental.pallas import tpu as pltpu


MXU_DTYPE = jnp.bfloat16   # bf16 operands, f32 accumulation on the MXU


def global_kernel(x_ref, adj_ref,
                  we1_ref, be1_ref, we2_ref, be2_ref,
                  was1_ref, bas1_ref, wa2_ref, ba2_ref,
                  struct_ref, xhat_ref, xenc_ref,
                  *, hid):
    """Fused forward pass of `Global` for one graph of the batch (inference).

    x_ref    : (N, F)   bf16 node features
    adj_ref  : (N, N)   bf16 dense adjacency (shared by all 5 GCN layers)
    w*_ref   : bf16 GraphConvolution weights, stored (in_features, out_features)
               was1 = concat(w_a1, w_s1) along out dim -> (H, 2H)
    b*_ref   : f32 biases, stored (1, out_features); bas1 = concat(b_a1, b_s1)
    outputs  : struct_ref (N, N), xhat_ref (N, F), xenc_ref (N, H)  (f32)
    """
    adj = adj_ref[...]                                   # already bf16

    def gcn_relu(h_bf16, w_ref, b_ref):
        # GraphConvolution_G + F.relu:  relu(adj @ (h @ W) + b)
        support = jnp.dot(h_bf16, w_ref[...],
                          preferred_element_type=jnp.float32)
        out = jnp.dot(adj, support.astype(MXU_DTYPE),
                      preferred_element_type=jnp.float32)
        return jnp.maximum(out + b_ref[...], 0.0)

    # ---- shared encoder (Encoder_G) ----
    h1 = gcn_relu(x_ref[...], we1_ref, be1_ref)          # (N, H)
    # TODO(synk): F.dropout omitted (inference / training=False => identity).
    x_enc = gcn_relu(h1.astype(MXU_DTYPE), we2_ref, be2_ref)   # (N, H)
    x_enc_b = x_enc.astype(MXU_DTYPE)

    # ---- decoder gc1 layers fused (attribute || structure) ----
    # One 256-wide matmul pair instead of two 128-wide pairs (fills the
    # 256x256 MXU on v6e/v7x); lane-aligned slice afterwards (H = 128).
    d1 = gcn_relu(x_enc_b, was1_ref, bas1_ref)           # (N, 2H)
    a1 = d1[:, :hid]                                     # attribute branch
    s1 = d1[:, hid:]                                     # structure branch

    # ---- attribute decoder gc2 ----
    x_hat = gcn_relu(a1.astype(MXU_DTYPE), wa2_ref, ba2_ref)   # (N, F)

    # ---- structure decoder reconstruction: s1 @ s1.T ----
    # Contraction on dim 1 of both operands feeds the MXU's transposed-RHS
    # path directly (no materialized O(N^2) transpose copy at these shapes).
    s1b = s1.astype(MXU_DTYPE)
    struct = jax.lax.dot_general(
        s1b, s1b, dimension_numbers=(((1,), (1,)), ((), ())),
        preferred_element_type=jnp.float32)              # (N, N)

    # Single, lane-dense store per output (last dims are multiples of 128).
    struct_ref[...] = struct
    xhat_ref[...] = x_hat
    xenc_ref[...] = x_enc


def global_forward(params, x, adj):
    """Batched forward. x: (B, N, F), adj: (B, N, N); weights shared."""
    B, N, F = x.shape
    H = params['w_e1'].shape[1]

    # ---- prepare bf16 MXU operands once, outside the kernel ----
    bf = lambda a: a.astype(MXU_DTYPE)
    x_b = bf(x)
    adj_b = bf(adj)
    w_e1 = bf(params['w_e1'])
    w_e2 = bf(params['w_e2'])
    w_as1 = bf(jnp.concatenate([params['w_a1'], params['w_s1']], axis=1))  # (H, 2H)
    b_as1 = jnp.concatenate([params['b_a1'], params['b_s1']], axis=1)      # (1, 2H) f32
    w_a2 = bf(params['w_a2'])
    b_e1, b_e2, b_a2 = params['b_e1'], params['b_e2'], params['b_a2']      # f32

    # ---- BlockSpecs: per-graph tiles over the batch axis, shared weights ----
    def graph_spec(d1, d2):
        return pl.BlockSpec((pl.Squeezed(), d1, d2), lambda b: (b, 0, 0))

    def shared_spec(shape):
        return pl.BlockSpec(shape, lambda b: (0, 0))

    in_specs = [
        graph_spec(N, F),             # x
        graph_spec(N, N),             # adj
        shared_spec((F, H)),          # w_e1
        shared_spec((1, H)),          # b_e1
        shared_spec((H, H)),          # w_e2
        shared_spec((1, H)),          # b_e2
        shared_spec((H, 2 * H)),      # w_as1 (attr||struct gc1 fused)
        shared_spec((1, 2 * H)),      # b_as1
        shared_spec((H, F)),          # w_a2
        shared_spec((1, F)),          # b_a2
    ]
    out_specs = (graph_spec(N, N), graph_spec(N, F), graph_spec(N, H))
    out_shape = (
        jax.ShapeDtypeStruct((B, N, N), jnp.float32),    # struct_reconstructed
        jax.ShapeDtypeStruct((B, N, F), jnp.float32),    # x_hat
        jax.ShapeDtypeStruct((B, N, H), jnp.float32),    # x (encoder output)
    )

    # ---- advisory cost estimate for XLA's scheduler ----
    flops_per_graph = 2 * (
        N * F * H + N * N * H            # encoder gc1
        + N * H * H + N * N * H          # encoder gc2
        + N * H * (2 * H) + N * N * (2 * H)   # fused decoder gc1 (attr||struct)
        + N * H * F + N * N * F          # attribute gc2
        + N * N * H                      # structure reconstruction s1 @ s1.T
    )
    inputs = (x_b, adj_b, w_e1, b_e1, w_e2, b_e2, w_as1, b_as1, w_a2, b_a2)
    bytes_in = sum(int(a.size) * a.dtype.itemsize for a in inputs)
    bytes_out = B * (N * N + N * F + N * H) * 4
    cost = pl.CostEstimate(flops=B * flops_per_graph, transcendentals=0,
                           bytes_accessed=bytes_in + bytes_out)

    return pl.pallas_call(
        partial(global_kernel, hid=H),
        out_shape=out_shape,
        grid=(B,),
        in_specs=in_specs,
        out_specs=out_specs,
        cost_estimate=cost,
        compiler_params=pltpu.CompilerParams(
            dimension_semantics=("parallel",),            # megacore on v7x
            # Fine for demo shapes (<1 MiB live per graph); raise per
            # generation under whole-array residency at large N (see TODO).
            vmem_limit_bytes=32 * 1024 * 1024),
    )(x_b, adj_b, w_e1, b_e1, w_e2, b_e2, w_as1, b_as1, w_a2, b_a2)


# ------------- deterministic parameter init (mirrors reset_parameters) ------

def _gcn_init(key, in_f, out_f):
    # GraphConvolution_G.reset_parameters: stdv = 1/sqrt(out_features),
    # weight ~ U(-stdv, stdv), bias ~ U(-stdv, stdv).
    stdv = 1.0 / math.sqrt(out_f)
    kw, kb = jax.random.split(key)
    w = jax.random.uniform(kw, (in_f, out_f), jnp.float32, -stdv, stdv)
    b = jax.random.uniform(kb, (1, out_f), jnp.float32, -stdv, stdv)
    return w, b


def init_global_params(key, feat_size, hidden_size):
    k = jax.random.split(key, 5)
    w_e1, b_e1 = _gcn_init(k[0], feat_size, hidden_size)    # Encoder_G.gc1
    w_e2, b_e2 = _gcn_init(k[1], hidden_size, hidden_size)  # Encoder_G.gc2
    w_a1, b_a1 = _gcn_init(k[2], hidden_size, hidden_size)  # Attr_Decoder.gc1
    w_a2, b_a2 = _gcn_init(k[3], hidden_size, feat_size)    # Attr_Decoder.gc2
    w_s1, b_s1 = _gcn_init(k[4], hidden_size, hidden_size)  # Struct_Decoder.gc1
    return dict(w_e1=w_e1, b_e1=b_e1, w_e2=w_e2, b_e2=b_e2,
                w_a1=w_a1, b_a1=b_a1, w_a2=w_a2, b_a2=b_a2,
                w_s1=w_s1, b_s1=b_s1)


if __name__ == "__main__":
    # Small but (8,128)-aligned shapes: full MXU tiles, unmasked lane-dense
    # stores.  Batch of 2 graphs exercises the parallel grid axis.
    B, N, FEAT, HID = 2, 128, 256, 128
    DROPOUT = 0.3   # unused at inference

    key = jax.random.PRNGKey(0)
    kp, kx, ka = jax.random.split(key, 3)

    params = init_global_params(kp, FEAT, HID)
    x = jax.random.normal(kx, (B, N, FEAT), jnp.float32)
    adj = jax.random.uniform(ka, (B, N, N), jnp.float32) / N   # ~normalized

    fwd = jax.jit(global_forward)
    struct_reconstructed, x_hat, x_enc = fwd(params, x, adj)
    jax.block_until_ready((struct_reconstructed, x_hat, x_enc))

    assert struct_reconstructed.shape == (B, N, N)
    assert x_hat.shape == (B, N, FEAT)
    assert x_enc.shape == (B, N, HID)
    assert bool(jnp.isfinite(struct_reconstructed).all())
    assert bool(jnp.isfinite(x_hat).all())
    assert bool(jnp.isfinite(x_enc).all())
    print("KERNEL_OK")
</pallas_src>

<mosaic_0001>
module attributes {stable_mosaic.version = 11 : i64} {
  func.func @global_kernel(%arg0: i32, %arg1: memref<1x128x256xbf16, #tpu.memory_space<vmem>>, %arg2: memref<1x128x128xbf16, #tpu.memory_space<vmem>>, %arg3: memref<256x128xbf16, #tpu.memory_space<vmem>>, %arg4: memref<1x128xf32, #tpu.memory_space<vmem>>, %arg5: memref<128x128xbf16, #tpu.memory_space<vmem>>, %arg6: memref<1x128xf32, #tpu.memory_space<vmem>>, %arg7: memref<128x256xbf16, #tpu.memory_space<vmem>>, %arg8: memref<1x256xf32, #tpu.memory_space<vmem>>, %arg9: memref<128x256xbf16, #tpu.memory_space<vmem>>, %arg10: memref<1x256xf32, #tpu.memory_space<vmem>>, %arg11: memref<1x128x128xf32, #tpu.memory_space<vmem>>, %arg12: memref<1x128x256xf32, #tpu.memory_space<vmem>>, %arg13: memref<1x128x128xf32, #tpu.memory_space<vmem>>) attributes {dimension_semantics = [#tpu.dimension_semantics<parallel>], iteration_bounds = array<i64: 2>, scalar_prefetch = 0 : i64, scratch_operands = 0 : i64, tpu.core_type = #tpu.core_type<tc>, window_params = [{transform_indices = @transform_0, window_bounds = array<i64: 1, 128, 256>}, {transform_indices = @transform_1, window_bounds = array<i64: 1, 128, 128>}, {pipeline_mode = #tpu.pipeline_mode<synchronous>, transform_indices = @transform_2, window_bounds = array<i64: 256, 128>}, {pipeline_mode = #tpu.pipeline_mode<synchronous>, transform_indices = @transform_3, window_bounds = array<i64: 1, 128>}, {pipeline_mode = #tpu.pipeline_mode<synchronous>, transform_indices = @transform_4, window_bounds = array<i64: 128, 128>}, {pipeline_mode = #tpu.pipeline_mode<synchronous>, transform_indices = @transform_5, window_bounds = array<i64: 1, 128>}, {pipeline_mode = #tpu.pipeline_mode<synchronous>, transform_indices = @transform_6, window_bounds = array<i64: 128, 256>}, {pipeline_mode = #tpu.pipeline_mode<synchronous>, transform_indices = @transform_7, window_bounds = array<i64: 1, 256>}, {pipeline_mode = #tpu.pipeline_mode<synchronous>, transform_indices = @transform_8, window_bounds = array<i64: 128, 256>}, {pipeline_mode = #tpu.pipeline_mode<synchronous>, transform_indices = @transform_9, window_bounds = array<i64: 1, 256>}, {transform_indices = @transform_10, window_bounds = array<i64: 1, 128, 128>}, {transform_indices = @transform_11, window_bounds = array<i64: 1, 128, 256>}, {transform_indices = @transform_12, window_bounds = array<i64: 1, 128, 128>}]} {
    %c0 = arith.constant 0 : index
    %c0_0 = arith.constant 0 : index
    %c0_1 = arith.constant 0 : index
    %0 = vector.load %arg2[%c0, %c0_0, %c0_1] : memref<1x128x128xbf16, #tpu.memory_space<vmem>>, vector<1x128x128xbf16>
    %1 = vector.shape_cast %0 : vector<1x128x128xbf16> to vector<128x128xbf16>
    %c0_2 = arith.constant 0 : index
    %c0_3 = arith.constant 0 : index
    %c0_4 = arith.constant 0 : index
    %2 = vector.load %arg1[%c0_2, %c0_3, %c0_4] : memref<1x128x256xbf16, #tpu.memory_space<vmem>>, vector<1x128x256xbf16>
    %3 = vector.shape_cast %2 : vector<1x128x256xbf16> to vector<128x256xbf16>
    %c0_5 = arith.constant 0 : index
    %c0_6 = arith.constant 0 : index
    %4 = vector.load %arg3[%c0_5, %c0_6] : memref<256x128xbf16, #tpu.memory_space<vmem>>, vector<256x128xbf16>
    %cst = arith.constant dense<0.000000e+00> : vector<128x128xf32>
    %5 = tpu.matmul %3, %4, %cst {dimension_numbers = #tpu.dot_dimension_numbers<[1], [0], [0], [1], [0, 0, 1, 1], [], []>} : vector<128x256xbf16>, vector<256x128xbf16>, vector<128x128xf32> -> vector<128x128xf32>
    %6 = arith.truncf %5 : vector<128x128xf32> to vector<128x128xbf16>
    %cst_7 = arith.constant dense<0.000000e+00> : vector<128x128xf32>
    %7 = tpu.matmul %1, %6, %cst_7 {dimension_numbers = #tpu.dot_dimension_numbers<[1], [0], [0], [1], [0, 0, 1, 1], [], []>} : vector<128x128xbf16>, vector<128x128xbf16>, vector<128x128xf32> -> vector<128x128xf32>
    %c0_8 = arith.constant 0 : index
    %c0_9 = arith.constant 0 : index
    %8 = vector.load %arg4[%c0_8, %c0_9] : memref<1x128xf32, #tpu.memory_space<vmem>>, vector<1x128xf32>
    %9 = vector.broadcast %8 : vector<1x128xf32> to vector<128x128xf32>
    %10 = arith.addf %7, %9 : vector<128x128xf32>
    %cst_10 = arith.constant 0.000000e+00 : f32
    %11 = vector.broadcast %cst_10 : f32 to vector<128x128xf32>
    %12 = arith.maximumf %10, %11 : vector<128x128xf32>
    %13 = arith.truncf %12 : vector<128x128xf32> to vector<128x128xbf16>
    %c0_11 = arith.constant 0 : index
    %c0_12 = arith.constant 0 : index
    %14 = vector.load %arg5[%c0_11, %c0_12] : memref<128x128xbf16, #tpu.memory_space<vmem>>, vector<128x128xbf16>
    %cst_13 = arith.constant dense<0.000000e+00> : vector<128x128xf32>
    %15 = tpu.matmul %13, %14, %cst_13 {dimension_numbers = #tpu.dot_dimension_numbers<[1], [0], [0], [1], [0, 0, 1, 1], [], []>} : vector<128x128xbf16>, vector<128x128xbf16>, vector<128x128xf32> -> vector<128x128xf32>
    %16 = arith.truncf %15 : vector<128x128xf32> to vector<128x128xbf16>
    %cst_14 = arith.constant dense<0.000000e+00> : vector<128x128xf32>
    %17 = tpu.matmul %1, %16, %cst_14 {dimension_numbers = #tpu.dot_dimension_numbers<[1], [0], [0], [1], [0, 0, 1, 1], [], []>} : vector<128x128xbf16>, vector<128x128xbf16>, vector<128x128xf32> -> vector<128x128xf32>
    %c0_15 = arith.constant 0 : index
    %c0_16 = arith.constant 0 : index
    %18 = vector.load %arg6[%c0_15, %c0_16] : memref<1x128xf32, #tpu.memory_space<vmem>>, vector<1x128xf32>
    %19 = vector.broadcast %18 : vector<1x128xf32> to vector<128x128xf32>
    %20 = arith.addf %17, %19 : vector<128x128xf32>
    %cst_17 = arith.constant 0.000000e+00 : f32
    %21 = vector.broadcast %cst_17 : f32 to vector<128x128xf32>
    %22 = arith.maximumf %20, %21 : vector<128x128xf32>
    %23 = arith.truncf %22 : vector<128x128xf32> to vector<128x128xbf16>
    %c0_18 = arith.constant 0 : index
    %c0_19 = arith.constant 0 : index
    %24 = vector.load %arg7[%c0_18, %c0_19] : memref<128x256xbf16, #tpu.memory_space<vmem>>, vector<128x256xbf16>
    %cst_20 = arith.constant dense<0.000000e+00> : vector<128x256xf32>
    %25 = tpu.matmul %23, %24, %cst_20 {dimension_numbers = #tpu.dot_dimension_numbers<[1], [0], [0], [1], [0, 0, 1, 1], [], []>} : vector<128x128xbf16>, vector<128x256xbf16>, vector<128x256xf32> -> vector<128x256xf32>
    %26 = arith.truncf %25 : vector<128x256xf32> to vector<128x256xbf16>
    %cst_21 = arith.constant dense<0.000000e+00> : vector<128x256xf32>
    %27 = tpu.matmul %1, %26, %cst_21 {dimension_numbers = #tpu.dot_dimension_numbers<[1], [0], [0], [1], [0, 0, 1, 1], [], []>} : vector<128x128xbf16>, vector<128x256xbf16>, vector<128x256xf32> -> vector<128x256xf32>
    %c0_22 = arith.constant 0 : index
    %c0_23 = arith.constant 0 : index
    %28 = vector.load %arg8[%c0_22, %c0_23] : memref<1x256xf32, #tpu.memory_space<vmem>>, vector<1x256xf32>
    %29 = vector.broadcast %28 : vector<1x256xf32> to vector<128x256xf32>
    %30 = arith.addf %27, %29 : vector<128x256xf32>
    %cst_24 = arith.constant 0.000000e+00 : f32
    %31 = vector.broadcast %cst_24 : f32 to vector<128x256xf32>
    %32 = arith.maximumf %30, %31 : vector<128x256xf32>
    %33 = vector.extract_strided_slice %32 {offsets = [0, 0], sizes = [128, 128], strides = [1, 1]} : vector<128x256xf32> to vector<128x128xf32>
    %34 = vector.extract_strided_slice %32 {offsets = [0, 128], sizes = [128, 128], strides = [1, 1]} : vector<128x256xf32> to vector<128x128xf32>
    %35 = arith.truncf %33 : vector<128x128xf32> to vector<128x128xbf16>
    %c0_25 = arith.constant 0 : index
    %c0_26 = arith.constant 0 : index
    %36 = vector.load %arg9[%c0_25, %c0_26] : memref<128x256xbf16, #tpu.memory_space<vmem>>, vector<128x256xbf16>
    %cst_27 = arith.constant dense<0.000000e+00> : vector<128x256xf32>
    %37 = tpu.matmul %35, %36, %cst_27 {dimension_numbers = #tpu.dot_dimension_numbers<[1], [0], [0], [1], [0, 0, 1, 1], [], []>} : vector<128x128xbf16>, vector<128x256xbf16>, vector<128x256xf32> -> vector<128x256xf32>
    %38 = arith.truncf %37 : vector<128x256xf32> to vector<128x256xbf16>
    %cst_28 = arith.constant dense<0.000000e+00> : vector<128x256xf32>
    %39 = tpu.matmul %1, %38, %cst_28 {dimension_numbers = #tpu.dot_dimension_numbers<[1], [0], [0], [1], [0, 0, 1, 1], [], []>} : vector<128x128xbf16>, vector<128x256xbf16>, vector<128x256xf32> -> vector<128x256xf32>
    %c0_29 = arith.constant 0 : index
    %c0_30 = arith.constant 0 : index
    %40 = vector.load %arg10[%c0_29, %c0_30] : memref<1x256xf32, #tpu.memory_space<vmem>>, vector<1x256xf32>
    %41 = vector.broadcast %40 : vector<1x256xf32> to vector<128x256xf32>
    %42 = arith.addf %39, %41 : vector<128x256xf32>
    %cst_31 = arith.constant 0.000000e+00 : f32
    %43 = vector.broadcast %cst_31 : f32 to vector<128x256xf32>
    %44 = arith.maximumf %42, %43 : vector<128x256xf32>
    %45 = arith.truncf %34 : vector<128x128xf32> to vector<128x128xbf16>
    %cst_32 = arith.constant dense<0.000000e+00> : vector<128x128xf32>
    %46 = tpu.matmul %45, %45, %cst_32 {dimension_numbers = #tpu.dot_dimension_numbers<[1], [1], [0], [0], [0, 0, 1, 0], [], []>} : vector<128x128xbf16>, vector<128x128xbf16>, vector<128x128xf32> -> vector<128x128xf32>
    %c0_33 = arith.constant 0 : index
    %c0_34 = arith.constant 0 : index
    %c0_35 = arith.constant 0 : index
    %47 = vector.load %arg11[%c0_33, %c0_34, %c0_35] : memref<1x128x128xf32, #tpu.memory_space<vmem>>, vector<1x128x128xf32>
    %48 = vector.shape_cast %47 : vector<1x128x128xf32> to vector<128x128xf32>
    %49 = vector.shape_cast %46 : vector<128x128xf32> to vector<1x128x128xf32>
    tpu.vector_store %arg11[%c0_33, %c0_34, %c0_35], %49 {strides = array<i32>} : memref<1x128x128xf32, #tpu.memory_space<vmem>>, vector<1x128x128xf32>,
    %c0_36 = arith.constant 0 : index
    %c0_37 = arith.constant 0 : index
    %c0_38 = arith.constant 0 : index
    %50 = vector.load %arg12[%c0_36, %c0_37, %c0_38] : memref<1x128x256xf32, #tpu.memory_space<vmem>>, vector<1x128x256xf32>
    %51 = vector.shape_cast %50 : vector<1x128x256xf32> to vector<128x256xf32>
    %52 = vector.shape_cast %44 : vector<128x256xf32> to vector<1x128x256xf32>
    tpu.vector_store %arg12[%c0_36, %c0_37, %c0_38], %52 {strides = array<i32>} : memref<1x128x256xf32, #tpu.memory_space<vmem>>, vector<1x128x256xf32>,
    %c0_39 = arith.constant 0 : index
    %c0_40 = arith.constant 0 : index
    %c0_41 = arith.constant 0 : index
    %53 = vector.load %arg13[%c0_39, %c0_40, %c0_41] : memref<1x128x128xf32, #tpu.memory_space<vmem>>, vector<1x128x128xf32>
    %54 = vector.shape_cast %53 : vector<1x128x128xf32> to vector<128x128xf32>
    %55 = vector.shape_cast %22 : vector<128x128xf32> to vector<1x128x128xf32>
    tpu.vector_store %arg13[%c0_39, %c0_40, %c0_41], %55 {strides = array<i32>} : memref<1x128x128xf32, #tpu.memory_space<vmem>>, vector<1x128x128xf32>,
    return
  }
  func.func @transform_0(%arg0: i32) -> (i32, i32, i32) {
    %c0_i32 = arith.constant 0 : i32
    %c0_i32_0 = arith.constant 0 : i32
    %c0_i32_1 = arith.constant 0 : i32
    return %arg0, %c0_i32, %c0_i32_0 : i32, i32, i32
  }
  func.func @transform_1(%arg0: i32) -> (i32, i32, i32) {
    %c0_i32 = arith.constant 0 : i32
    %c0_i32_0 = arith.constant 0 : i32
    %c0_i32_1 = arith.constant 0 : i32
    return %arg0, %c0_i32, %c0_i32_0 : i32, i32, i32
  }
  func.func @transform_2(%arg0: i32) -> (i32, i32) {
    %c0_i32 = arith.constant 0 : i32
    %c0_i32_0 = arith.constant 0 : i32
    %c0_i32_1 = arith.constant 0 : i32
    return %c0_i32, %c0_i32_0 : i32, i32
  }
  func.func @transform_3(%arg0: i32) -> (i32, i32) {
    %c0_i32 = arith.constant 0 : i32
    %c0_i32_0 = arith.constant 0 : i32
    %c0_i32_1 = arith.constant 0 : i32
    return %c0_i32, %c0_i32_0 : i32, i32
  }
  func.func @transform_4(%arg0: i32) -> (i32, i32) {
    %c0_i32 = arith.constant 0 : i32
    %c0_i32_0 = arith.constant 0 : i32
    %c0_i32_1 = arith.constant 0 : i32
    return %c0_i32, %c0_i32_0 : i32, i32
  }
  func.func @transform_5(%arg0: i32) -> (i32, i32) {
    %c0_i32 = arith.constant 0 : i32
    %c0_i32_0 = arith.constant 0 : i32
    %c0_i32_1 = arith.constant 0 : i32
    return %c0_i32, %c0_i32_0 : i32, i32
  }
  func.func @transform_6(%arg0: i32) -> (i32, i32) {
    %c0_i32 = arith.constant 0 : i32
    %c0_i32_0 = arith.constant 0 : i32
    %c0_i32_1 = arith.constant 0 : i32
    return %c0_i32, %c0_i32_0 : i32, i32
  }
  func.func @transform_7(%arg0: i32) -> (i32, i32) {
    %c0_i32 = arith.constant 0 : i32
    %c0_i32_0 = arith.constant 0 : i32
    %c0_i32_1 = arith.constant 0 : i32
    return %c0_i32, %c0_i32_0 : i32, i32
  }
  func.func @transform_8(%arg0: i32) -> (i32, i32) {
    %c0_i32 = arith.constant 0 : i32
    %c0_i32_0 = arith.constant 0 : i32
    %c0_i32_1 = arith.constant 0 : i32
    return %c0_i32, %c0_i32_0 : i32, i32
  }
  func.func @transform_9(%arg0: i32) -> (i32, i32) {
    %c0_i32 = arith.constant 0 : i32
    %c0_i32_0 = arith.constant 0 : i32
    %c0_i32_1 = arith.constant 0 : i32
    return %c0_i32, %c0_i32_0 : i32, i32
  }
  func.func @transform_10(%arg0: i32) -> (i32, i32, i32) {
    %c0_i32 = arith.constant 0 : i32
    %c0_i32_0 = arith.constant 0 : i32
    %c0_i32_1 = arith.constant 0 : i32
    return %arg0, %c0_i32, %c0_i32_0 : i32, i32, i32
  }
  func.func @transform_11(%arg0: i32) -> (i32, i32, i32) {
    %c0_i32 = arith.constant 0 : i32
    %c0_i32_0 = arith.constant 0 : i32
    %c0_i32_1 = arith.constant 0 : i32
    return %arg0, %c0_i32, %c0_i32_0 : i32, i32, i32
  }
  func.func @transform_12(%arg0: i32) -> (i32, i32, i32) {
    %c0_i32 = arith.constant 0 : i32
    %c0_i32_0 = arith.constant 0 : i32
    %c0_i32_1 = arith.constant 0 : i32
    return %arg0, %c0_i32, %c0_i32_0 : i32, i32, i32
  }
}

</mosaic_0001>

<bundles_post_ra>
// kernel: global_forward.1
= control target key start
LH: loop header
LB: loop body
LE: loop exit
PB: predicated region body
PF: predicated region fallthrough
CT: control target
= control target key end

     0   :  { %s3856_s0 = inlined_call_operand.vmem [shape: bf16[2,128,256], index: 0, kind: input, shape index: {}]   ;;  %s3857_s1 = inlined_call_operand.vmem [shape: bf16[2,128,128], index: 1, kind: input, shape index: {}]   ;;  %s3858_s2 = inlined_call_operand.vmem [shape: bf16[256,128], index: 2, kind: input, shape index: {}]   ;;  %s3859_s3 = inlined_call_operand.vmem [shape: f32[1,128], index: 3, kind: input, shape index: {}]   ;;  %s3860_s4 = inlined_call_operand.vmem [shape: bf16[128,128], index: 4, kind: input, shape index: {}]   ;;  %s3861_s5 = inlined_call_operand.vmem [shape: f32[1,128], index: 5, kind: input, shape index: {}]   ;;  %s3862_s6 = inlined_call_operand.vmem [shape: bf16[128,256], index: 6, kind: input, shape index: {}]   ;;  %s3863_s7 = inlined_call_operand.vmem [shape: f32[1,256], index: 7, kind: input, shape index: {}]   ;;  %s3864_s8 = inlined_call_operand.vmem [shape: bf16[128,256], index: 8, kind: input, shape index: {}]   ;;  %s3865_s9 = inlined_call_operand.vmem [shape: f32[1,256], index: 9, kind: input, shape index: {}]   ;;  %s3866_s10 = inlined_call_operand.hbm [shape: f32[2,128,128], index: 10, kind: output, shape index: {0}]   ;;  %s3867_s11 = inlined_call_operand.hbm [shape: f32[2,128,256], index: 11, kind: output, shape index: {1}]   ;;  %s3868_s12 = inlined_call_operand.hbm [shape: f32[2,128,128], index: 12, kind: output, shape index: {2}]  }
   0x1   :  { %3875 = sst [smem:[#allocation11_spill]] %s3856_s0 }
   0x2   :  { %3876 = sst [smem:[#allocation12_spill]] %s3857_s1 }
   0x3   :  { %18 = vsyncpa [#allocation3], 0 }
   0x4   :  { %20 = vsyncpa [#allocation3 + $0x1], 0 }
   0x5   :  { %21 = vsyncpa [#allocation5], 0 }
   0x6   :  { %23 = vsyncpa [#allocation5 + $0x1], 0  ;;  %s3123_s21 = smov 0   ;;  %s3125_s22 = smov 0  }
   0x7   :  { %s3127_s23 = smov 0   ;;  %s3129_s24 = smov 0  }
   0x8 LB: > { %3877 = sst [smem:[#allocation9_spill]] %s3044_s23  ;;  %s3144_s25 = sadd.s32 4294967295, %s3048_s24   ;;  %s3048_s24 = sphi %s3129_s24, %s3893_s24   ;;  %s3044_s23 = sphi %s3127_s23, %s3890_s23   ;;  %s3040_s22 = sphi %s3125_s22, %s3892_s22   ;;  %s3036_s21 = sphi %s3123_s21, %s3891_s21  }
   0x9   : > { %s3869_s26 = sadd.s32 4294967294, %s3048_s24   ;;  %s3148_s27 = sadd.s32 1, %s3048_s24  }
   0xa   : > { %s256_s28 = sadd.s32 1, %s3044_s23  ;;  %s253_s29 = ssub.s32 %s3048_s24, %s3148_s27 }
   0xb   : > { %p266_p0 = scmp.ne.s32.totalorder %s3044_s23, %s3040_s22  ;;  %p254_p1 = scmp.eq.s32.totalorder %s253_s29, 0 }
   0xc   : > { %p267_p2 = scmp.eq.s32.totalorder %s3144_s25, 1  ;;  %p272_p3 = scmp.ne.s32.totalorder %s3040_s22, %s3036_s21 }
   0xd   : > { %p273_p4 = scmp.eq.s32.totalorder %s3869_s26, 1  ;;  %p2404_p7 = scmp.ge.s32.totalorder %s3048_s24, 1 }
   0xe   : > { %s3161_s30 = scalar_select %p254_p1, %s3044_s23, %s256_s28  }
   0xf   : > { %p3163_p5 = por %p267_p2, %p266_p0  ;;  %p3167_p6 = por %p273_p4, %p272_p3 }
  0x10   : > { %3878 = sst [smem:[#allocation10_spill]] %s3161_s30  ;;  %p383_p8 = scmp.lt.s32.totalorder %s3048_s24, 3 }
  0x12   : > { %p384_p9 = pnand %p2404_p7, %p383_p8 }
  0x13   : > { %p440_p10 = scmp.lt.s32.totalorder (!%p384_p9), %s3144_s25, 1  ;;  %s3881_s0 = sld [smem:[#allocation11_spill]] (!%p384_p9) }
  0x14   : > { %387 = sbr.rel (%p384_p9) target bundleno = 2091 (0x82b), region = 60  ;;  %s3882_s1 = sld [smem:[#allocation12_spill]] (!%p384_p9) }
  0x15   : > { %s3371_s28 = sand.u32 (!%p384_p9), 1, %s3040_s22  }
  0x16   : > { %s3871_s16 = sshll.u32 (!%p384_p9), %s3371_s28, 7 }
  0x19   : > { %v2820_v0 = vld [vmem:[%s3858_s2 + $0x78] sm:$0xff]   ;;  %v2822_v2 = vld [vmem:[%s3858_s2 + $0x70] sm:$0xff]   ;;  %v2824_v4 = vld [vmem:[%s3858_s2 + $0x68] sm:$0xff]   ;;  %s441_s18 = scalar_select %p440_p10, %s3144_s25, 1 }
  0x1a   : > { %v2821_v1 = vld [vmem:[%s3858_s2 + $0x38] sm:$0xff]   ;;  %2510 = vmatprep.subr.bf16.mxu0 %v2820_v0  ;;  %v2823_v3 = vld [vmem:[%s3858_s2 + $0x30] sm:$0xff]   ;;  %v2825_v5 = vld [vmem:[%s3858_s2 + $0x28] sm:$0xff]  }
  0x1b   : > { %2511 = vmatpush3.bf16.msra.mxu0 %v2821_v1  ;;  %v2826_v6 = vld [vmem:[%s3858_s2 + $0x60] sm:$0xff]   ;;  %s2505_s30 = sshll.u32 %s441_s18, 7  ;;  %v2828_v8 = vld [vmem:[%s3858_s2 + $0x58] sm:$0xff]   ;;  %v2830_v10 = vld [vmem:[%s3858_s2 + $0x50] sm:$0xff]   ;;  %s2506_s26 = sshll.u32 %s441_s18, 6 }
  0x1c   : > { %2512 = vmatprep.subr.bf16.mxu0 %v2822_v2  ;;  %v2827_v7 = vld [vmem:[%s3858_s2 + $0x20] sm:$0xff]   ;;  %s3205_s17 = scalar_lea.vmem %s3881_s0, %s2505_s30  ;;  %v2829_v9 = vld [vmem:[%s3858_s2 + $0x18] sm:$0xff]   ;;  %v2831_v12 = vld [vmem:[%s3858_s2 + $0x10] sm:$0xff]   ;;  %s3229_s23 = scalar_lea.vmem %s3882_s1, %s2506_s26 }
  0x1d   : > { %v2838_v11 = vld [vmem:[%s3205_s17 + $0x4] ss:$8 sps:$4 sm:$0xff]   ;;  %v2836_v17 = vld [vmem:[%s3205_s17] ss:$8 sps:$4 sm:$0xff]   ;;  %v2839_v18 = vld [vmem:[%s3205_s17 + $0x14] ss:$8 sps:$4 sm:$0xff]  }
  0x1e   : > { %723 = vmatprep.mubr.bf16.mxu0 %v2838_v11  ;;  %v2832_v13 = vld [vmem:[%s3858_s2 + $0x48] sm:$0xff]   ;;  %v2834_v15 = vld [vmem:[%s3858_s2 + $0x40] sm:$0xff]   ;;  %v2841_v19 = vld [vmem:[%s3205_s17 + $0x10] ss:$8 sps:$4 sm:$0xff]   ;;  %s3383_s30 = scalar_lea.vmem [#allocation6], %s3871_s16  ;;  %s3883_s16 = sshll.u32 %s3371_s28, 7 }
  0x1f   : > { %2513 = vmatpush3.bf16.msra.mxu0 %v2823_v3  ;;  %v2833_v14 = vld [vmem:[%s3858_s2 + $0x8] sm:$0xff]   ;;  %v2835_v16 = vld [vmem:[%s3858_s2] sm:$0xff]   ;;  %v2845_v22 = vld [vmem:[%s3205_s17 + $0x34] ss:$8 sps:$4 sm:$0xff]   ;;  %s3630_s15 = scalar_lea.vmem [#allocation2], %s3883_s16  ;;  %s3872_s0 = sshll.u32 %s3144_s25, 11 }
  0x20   : > { %2514 = vmatprep.subr.bf16.mxu0 %v2824_v4  ;;  %v2842_v20 = vld [vmem:[%s3205_s17 + $0x24] ss:$8 sps:$4 sm:$0xff]   ;;  %v2844_v21 = vld [vmem:[%s3205_s17 + $0x20] ss:$8 sps:$4 sm:$0xff]   ;;  %v2847_v23 = vld [vmem:[%s3205_s17 + $0x30] ss:$8 sps:$4 sm:$0xff]   ;;  %s3662_s19 = scalar_lea.hbm %s3866_s10, %s3872_s0 }
  0x21   : > { %v2848_v24 = vld [vmem:[%s3205_s17 + $0x44] ss:$8 sps:$4 sm:$0xff]   ;;  %v2850_v25 = vld [vmem:[%s3205_s17 + $0x40] ss:$8 sps:$4 sm:$0xff]   ;;  %v2851_v26 = vld [vmem:[%s3205_s17 + $0x54] ss:$8 sps:$4 sm:$0xff]  }
  0x22   : > { %v2853_v27 = vld [vmem:[%s3205_s17 + $0x50] ss:$8 sps:$4 sm:$0xff]   ;;  %v2854_v28 = vld [vmem:[%s3205_s17 + $0x64] ss:$8 sps:$4 sm:$0xff]   ;;  %v2856_v29 = vld [vmem:[%s3205_s17 + $0x60] ss:$8 sps:$4 sm:$0xff]  }
  0x23   : > { %2515 = vmatpush3.bf16.msra.mxu0 %v2825_v5  ;;  %v2857_v30 = vld [vmem:[%s3205_s17 + $0x74] ss:$8 sps:$4 sm:$0xff]   ;;  %v2859_v31 = vld [vmem:[%s3205_s17 + $0x70] ss:$8 sps:$4 sm:$0xff]   ;;  %v3250_v32 = vld [vmem:[%s3229_s23] sm:$0xff]   ;;  %s2234_s18 = sshll.u32 %s3630_s15, 4  ;;  %s3664_s18 = int_to_ptr.vmem [resolvable:$true] %s2234_s18 }
  0x24   : > { %2516 = vmatprep.subr.bf16.mxu0 %v2826_v6  ;;  %2654 = vmatprep.mubr.bf16.mxu1 %v3250_v32  ;;  %s2932_s29 = scalar_lea.vmem %s3664_s18, 2048 }
  0x25   : > { %p2933_p11 = scmp.ne.s32.totalorder %s3664_s18, %s2932_s29 }
  0x27   : > { %2517 = vmatpush3.bf16.msra.mxu0 %v2827_v7  ;;  %p2934_p12 = pnand %p2933_p11, %p3163_p5 }
  0x28   : > { %2518 = vmatprep.subr.bf16.mxu0 %v2828_v8 }
  0x29   : > { %p2935_p13 = pneg %p2934_p12 }
  0x2b   : > { %2519 = vmatpush3.bf16.msra.mxu0 %v2829_v9 }
  0x2c   : > { %2520 = vmatprep.subr.bf16.mxu0 %v2830_v10 }
  0x2f   : > { %2521 = vmatpush3.bf16.msra.mxu0 %v2831_v12 }
  0x30   : > { %2522 = vmatprep.subr.bf16.mxu0 %v2832_v13 }
  0x33   : > { %2523 = vmatpush3.bf16.msra.mxu0 %v2833_v14 }
  0x34   : > { %2524 = vmatprep.subr.bf16.mxu0 %v2834_v15 }
  0x37   : > { %2525 = vmatpush3.bf16.msra.mxu0 %v2835_v16 }
  0x3a   : > { %724 = vmatmul.mubr.bf16.vlgmr.msra.gmra.mxu0 %v2836_v17 }
  0x3b   : > { %731 = vmatprep.mubr.bf16.mxu0 %v2839_v18 }
  0x42   : > { %732 = vmatmul.mubr.bf16.gmra.mxu0 %v2841_v19 }
  0x43   : > { %739 = vmatprep.mubr.bf16.mxu0 %v2842_v20 }
  0x4a   : > { %740 = vmatmul.mubr.bf16.gmra.mxu0 %v2844_v21 }
  0x4b   : > { %747 = vmatprep.mubr.bf16.mxu0 %v2845_v22 }
  0x52   : > { %748 = vmatmul.mubr.bf16.gmra.mxu0 %v2847_v23 }
  0x53   : > { %755 = vmatprep.mubr.bf16.mxu0 %v2848_v24 }
  0x5a   : > { %756 = vmatmul.mubr.bf16.gmra.mxu0 %v2850_v25  ;;  %v2868_v25 = vld [vmem:[%s3860_s4 + $0x38] sm:$0xff]  }
  0x5b   : > { %763 = vmatprep.mubr.bf16.mxu0 %v2851_v26  ;;  %v3261_v26 = vld [vmem:[%s3229_s23 + $0x8] sm:$0xff]  }
  0x62   : > { %764 = vmatmul.mubr.bf16.gmra.mxu0 %v2853_v27  ;;  %v3265_v27 = vld [vmem:[%s3229_s23 + $0x10] sm:$0xff]  }
  0x63   : > { %771 = vmatprep.mubr.bf16.mxu0 %v2854_v28  ;;  %v2869_v28 = vld [vmem:[%s3860_s4 + $0x30] sm:$0xff]  }
  0x6a   : > { %772 = vmatmul.mubr.bf16.gmra.mxu0 %v2856_v29  ;;  %v2870_v29 = vld [vmem:[%s3860_s4 + $0x28] sm:$0xff]  }
  0x6b   : > { %779 = vmatprep.mubr.bf16.mxu0 %v2857_v30  ;;  %v3276_v30 = vld [vmem:[%s3229_s23 + $0x18] sm:$0xff]  }
  0x72   : > { %780 = vmatmul.mubr.bf16.gmra.mxu0 %v2859_v31  ;;  %v3279_v31 = vld [vmem:[%s3229_s23 + $0x20] sm:$0xff]  }
  0x73   : > { %2718 = vmatprep.mubr.bf16.mxu0 %v3250_v32 }
  0xfa   : > { %v2526_v33 = vpop.f32.mrf.mxu0 }
  0xfc   : > { %v2527_v34 = vpop.f32.mrf.mxu0 }
  0xfd   : > { %v2528_v35 = vadd.f32 %v2527_v34, %v2526_v33  ;;  %v2871_v33 = vld [vmem:[%s3860_s4 + $0x20] sm:$0xff]   ;;  %v2872_v34 = vld [vmem:[%s3860_s4 + $0x18] sm:$0xff]  }
  0xfe   : > { %v2529_v36 = vpop.f32.mrf.mxu0 }
 0x100   : > { %v2530_v37 = vpop.f32.mrf.mxu0 }
 0x101   : > { %v2531_v38 = vadd.f32 %v2530_v37, %v2529_v36  ;;  %v3293_v36 = vld [vmem:[%s3229_s23 + $0x30] sm:$0xff]   ;;  %v3298_v37 = vld [vmem:[%s3229_s23 + $0x38] sm:$0xff]  }
 0x102   : > { %v2532_v39 = vpop.f32.mrf.mxu0 }
 0x103   : > { %v3254_v40 = vpack.c.bf16 %v2531_v38, %v2528_v35  ;;  %v3290_v35 = vld [vmem:[%s3229_s23 + $0x28] sm:$0xff]   ;;  %v2873_v38 = vld [vmem:[%s3860_s4 + $0x10] sm:$0xff]  }
 0x104   : > { %v2533_v41 = vpop.f32.mrf.mxu0 }
 0x105   : > { %v2534_v42 = vadd.f32 %v2533_v41, %v2532_v39  ;;  %v2874_v39 = vld [vmem:[%s3860_s4 + $0x8] sm:$0xff]  }
 0x106   : > { %v2535_v43 = vpop.f32.mrf.mxu0 }
 0x108   : > { %v2536_v44 = vpop.f32.mrf.mxu0 }
 0x109   : > { %v2537_v45 = vadd.f32 %v2536_v44, %v2535_v43  ;;  %v2444_v43 = vld [vmem:[%s3859_s3] ss:$0 sm:$0xff] }
 0x10a   : > { %v2538_v46 = vpop.f32.mrf.mxu0 }
 0x10b   : > { %v789_v47 = vpack.c.bf16 %v2537_v45, %v2534_v42 }
 0x10c   : > { %v2539_v48 = vpop.f32.mrf.mxu0 }
 0x10d   : > { %v2540_v23 = vadd.f32 %v2539_v48, %v2538_v46 }
 0x10e   : > { %v2541_v49 = vpop.f32.mrf.mxu0 }
 0x110   : > { %v2542_v50 = vpop.f32.mrf.mxu0 }
 0x111   : > { %v2543_v21 = vadd.f32 %v2542_v50, %v2541_v49 }
 0x112   : > { %v2544_v51 = vpop.f32.mrf.mxu0 }
 0x113   : > { %v790_v24 = vpack.c.bf16 %v2543_v21, %v2540_v23 }
 0x114   : > { %v2545_v52 = vpop.f32.mrf.mxu0 }
 0x115   : > { %v2546_v20 = vadd.f32 %v2545_v52, %v2544_v51 }
 0x116   : > { %v2547_v53 = vpop.f32.mrf.mxu0 }
 0x118   : > { %v2548_v54 = vpop.f32.mrf.mxu0 }
 0x119   : > { %v2549_v18 = vadd.f32 %v2548_v54, %v2547_v53 }
 0x11a   : > { %v2550_v55 = vpop.f32.mrf.mxu0 }
 0x11b   : > { %v791_v22 = vpack.c.bf16 %v2549_v18, %v2546_v20 }
 0x11c   : > { %v2551_v56 = vpop.f32.mrf.mxu0 }
 0x11d   : > { %v2552_v17 = vadd.f32 %v2551_v56, %v2550_v55 }
 0x11e   : > { %v2553_v57 = vpop.f32.mrf.mxu0 }
 0x120   : > { %v2554_v58 = vpop.f32.mrf.mxu0 }
 0x121   : > { %v2555_v15 = vadd.f32 %v2554_v58, %v2553_v57 }
 0x122   : > { %v2556_v59 = vpop.f32.mrf.mxu0 }
 0x123   : > { %v792_v19 = vpack.c.bf16 %v2555_v15, %v2552_v17 }
 0x124   : > { %v2557_v60 = vpop.f32.mrf.mxu0 }
 0x125   : > { %v2558_v14 = vadd.f32 %v2557_v60, %v2556_v59 }
 0x126   : > { %v2559_v61 = vpop.f32.mrf.mxu0 }
 0x128   : > { %v2560_v62 = vpop.f32.mrf.mxu0 }
 0x129   : > { %v2561_v12 = vadd.f32 %v2560_v62, %v2559_v61 }
 0x12a   : > { %v2562_v63 = vpop.f32.mrf.mxu0 }
 0x12b   : > { %v793_v16 = vpack.c.bf16 %v2561_v12, %v2558_v14 }
 0x12c   : > { %v2563_v0 = vpop.f32.mrf.mxu0 }
 0x12d   : > { %v2564_v10 = vadd.f32 %v2563_v0, %v2562_v63 }
 0x12e   : > { %v2565_v1 = vpop.f32.mrf.mxu0 }
 0x130   : > { %v2566_v2 = vpop.f32.mrf.mxu0 }
 0x131   : > { %v2567_v7 = vadd.f32 %v2566_v2, %v2565_v1 }
 0x132   : > { %v2568_v3 = vpop.f32.mrf.mxu0 }
 0x133   : > { %v794_v13 = vpack.c.bf16 %v2567_v7, %v2564_v10 }
 0x134   : > { %v2569_v4 = vpop.f32.mrf.mxu0 }
 0x135   : > { %v2570_v8 = vadd.f32 %v2569_v4, %v2568_v3 }
 0x136   : > { %v2571_v5 = vpop.f32.mrf.mxu0 }
 0x138   : > { %v2572_v6 = vpop.f32.mrf.mxu0 }
 0x139   : > { %v2573_v9 = vadd.f32 %v2572_v6, %v2571_v5 }
 0x13b   : > { %v795_v11 = vpack.c.bf16 %v2573_v9, %v2570_v8 }
 0x13d   : > { %2638 = vmatprep.subr.bf16.mxu1 %v795_v11 }
 0x13e   : > { %2639 = vmatpush3.bf16.msra.mxu1 %v795_v11 }
 0x13f   : > { %2640 = vmatprep.subr.bf16.mxu1 %v794_v13 }
 0x142   : > { %2641 = vmatpush3.bf16.msra.mxu1 %v794_v13 }
 0x143   : > { %2642 = vmatprep.subr.bf16.mxu1 %v793_v16 }
 0x146   : > { %2643 = vmatpush3.bf16.msra.mxu1 %v793_v16 }
 0x147   : > { %2644 = vmatprep.subr.bf16.mxu1 %v792_v19 }
 0x14a   : > { %2645 = vmatpush3.bf16.msra.mxu1 %v792_v19 }
 0x14b   : > { %2646 = vmatprep.subr.bf16.mxu1 %v791_v22 }
 0x14e   : > { %2647 = vmatpush3.bf16.msra.mxu1 %v791_v22 }
 0x14f   : > { %2648 = vmatprep.subr.bf16.mxu1 %v790_v24 }
 0x152   : > { %2649 = vmatpush3.bf16.msra.mxu1 %v790_v24 }
 0x153   : > { %2650 = vmatprep.subr.bf16.mxu1 %v789_v47 }
 0x156   : > { %2651 = vmatpush3.bf16.msra.mxu1 %v789_v47 }
 0x157   : > { %2652 = vmatprep.subr.bf16.mxu1 %v3254_v40 }
 0x15a   : > { %2653 = vmatpush3.bf16.msra.mxu1 %v3254_v40  ;;  %v2875_v40 = vld [vmem:[%s3860_s4] sm:$0xff]  }
 0x15b   : > { %2670 = vmatprep.subr.bf16.mxu1 %v2868_v25 }
 0x15d   : > { %2655 = vmatmul.mubr.bf16.vlgmr.msra.gmra.mxu1 %v3261_v26 }
 0x15e   : > { %2658 = vmatprep.mubr.bf16.mxu1 %v3265_v27  ;;  %2671 = vmatpush3.bf16.msra.mxu1 %v2868_v25 }
 0x15f   : > { %2672 = vmatprep.subr.bf16.mxu1 %v2869_v28 }
 0x162   : > { %2673 = vmatpush3.bf16.msra.mxu1 %v2869_v28 }
 0x163   : > { %2674 = vmatprep.subr.bf16.mxu1 %v2870_v29 }
 0x165   : > { %2659 = vmatmul.mubr.bf16.gmra.mxu1 %v3276_v30 }
 0x166   : > { %2662 = vmatprep.mubr.bf16.mxu1 %v3279_v31  ;;  %2675 = vmatpush3.bf16.msra.mxu1 %v2870_v29 }
 0x167   : > { %2676 = vmatprep.subr.bf16.mxu1 %v2871_v33 }
 0x16a   : > { %2677 = vmatpush3.bf16.msra.mxu1 %v2871_v33 }
 0x16b   : > { %2678 = vmatprep.subr.bf16.mxu1 %v2872_v34 }
 0x16d   : > { %2663 = vmatmul.mubr.bf16.gmra.mxu1 %v3290_v35 }
 0x16e   : > { %2666 = vmatprep.mubr.bf16.mxu1 %v3293_v36  ;;  %2679 = vmatpush3.bf16.msra.mxu1 %v2872_v34 }
 0x16f   : > { %2680 = vmatprep.subr.bf16.mxu1 %v2873_v38 }
 0x172   : > { %2681 = vmatpush3.bf16.msra.mxu1 %v2873_v38 }
 0x173   : > { %2682 = vmatprep.subr.bf16.mxu1 %v2874_v39 }
 0x175   : > { %2667 = vmatmul.mubr.bf16.gmra.mxu1 %v3298_v37 }
 0x176   : > { %2683 = vmatpush3.bf16.msra.mxu1 %v2874_v39 }
 0x177   : > { %2684 = vmatprep.subr.bf16.mxu1 %v2875_v40 }
 0x17a   : > { %2685 = vmatpush3.bf16.msra.mxu1 %v2875_v40 }
 0x21d   : > { %v2656_v41 = vpop.f32.mrf.mxu1 }
 0x21e   : > { %v894_v47 = vadd.f32 %v2656_v41, %v2444_v43 }
 0x21f   : > { %v885_v42 = vpop.f32.mrf.mxu1 }
 0x220   : > { %v886_v45 = vadd.f32 %v2444_v43, %v885_v42  ;;  %v950_v54 = vmax.f32 %v894_v47, 0.0  ;;  %v2876_v42 = vld [vmem:[%s3862_s6 + $0x70] ss:$8 sps:$4 sm:$0xff]  }
 0x221   : > { %v2657_v44 = vpop.f32.mrf.mxu1  ;;  %v2882_v47 = vld [vmem:[%s3862_s6 + $0x50] ss:$8 sps:$4 sm:$0xff]  }
 0x222   : > { %v897_v46 = vadd.f32 %v2657_v44, %v2444_v43  ;;  %v948_v52 = vmax.f32 %v886_v45, 0.0  ;;  %v2878_v44 = vld [vmem:[%s3862_s6 + $0x74] ss:$8 sps:$4 sm:$0xff]   ;;  %v2879_v45 = vld [vmem:[%s3862_s6 + $0x60] ss:$8 sps:$4 sm:$0xff]  }
 0x223   : > { %v888_v48 = vpop.f32.mrf.mxu1  ;;  %1365 = vmatprep.subr.bf16.mxu1 %v2878_v44 }
 0x224   : > { %v889_v49 = vadd.f32 %v2444_v43, %v888_v48  ;;  %v951_v50 = vmax.f32 %v897_v46, 0.0  ;;  %v2884_v46 = vld [vmem:[%s3862_s6 + $0x54] ss:$8 sps:$4 sm:$0xff]   ;;  %v2887_v48 = vld [vmem:[%s3862_s6 + $0x44] ss:$8 sps:$4 sm:$0xff]  }
 0x225   : > { %v2660_v51 = vpop.f32.mrf.mxu1 }
 0x226   : > { %v949_v53 = vmax.f32 %v889_v49, 0.0  ;;  %v965_v57 = vpack.c.bf16 %v951_v50, %v950_v54  ;;  %v910_v61 = vadd.f32 %v2660_v51, %v2444_v43  ;;  %v2885_v49 = vld [vmem:[%s3862_s6 + $0x40] ss:$8 sps:$4 sm:$0xff]   ;;  %v2890_v50 = vld [vmem:[%s3862_s6 + $0x34] ss:$8 sps:$4 sm:$0xff]  }
 0x227   : > { %v901_v55 = vpop.f32.mrf.mxu1  ;;  %v2888_v51 = vld [vmem:[%s3862_s6 + $0x30] ss:$8 sps:$4 sm:$0xff]  }
 0x228   : > { %v964_v56 = vpack.c.bf16 %v949_v53, %v948_v52  ;;  %v902_v59 = vadd.f32 %v2444_v43, %v901_v55  ;;  %v954_v4 = vmax.f32 %v910_v61, 0.0 }
 0x229   : > { %v2661_v58 = vpop.f32.mrf.mxu1 }
 0x22a   : > { %v913_v60 = vadd.f32 %v2661_v58, %v2444_v43  ;;  %2686 = vmatprep.mubr.bf16.mxu1 %v964_v56  ;;  %v952_v2 = vmax.f32 %v902_v59, 0.0 }
 0x22b   : > { %v904_v62 = vpop.f32.mrf.mxu1  ;;  %2687 = vmatmul.mubr.bf16.vlgmr.msra.gmra.mxu1 %v965_v57 }
 0x22c   : > { %v905_v63 = vadd.f32 %v2444_v43, %v904_v62  ;;  %v955_v0 = vmax.f32 %v913_v60, 0.0  ;;  %1366 = vmatpush1.bf16.msra.mxu1 %v2876_v42 }
 0x22d   : > { %v2664_v1 = vpop.f32.mrf.mxu1 }
 0x22e   : > { %v953_v3 = vmax.f32 %v905_v63, 0.0  ;;  %v967_v7 = vpack.c.bf16 %v955_v0, %v954_v4  ;;  %v926_v11 = vadd.f32 %v2664_v1, %v2444_v43 }
 0x22f   : > { %v917_v5 = vpop.f32.mrf.mxu1 }
 0x230   : > { %v966_v6 = vpack.c.bf16 %v953_v3, %v952_v2  ;;  %v918_v9 = vadd.f32 %v2444_v43, %v917_v5  ;;  %v958_v18 = vmax.f32 %v926_v11, 0.0 }
 0x231   : > { %v2665_v8 = vpop.f32.mrf.mxu1 }
 0x232   : > { %v929_v10 = vadd.f32 %v2665_v8, %v2444_v43  ;;  %2690 = vmatprep.mubr.bf16.mxu1 %v966_v6  ;;  %v956_v16 = vmax.f32 %v918_v9, 0.0 }
 0x233   : > { %v920_v12 = vpop.f32.mrf.mxu1  ;;  %2691 = vmatmul.mubr.bf16.gmra.mxu1 %v967_v7 }
 0x234   : > { %v921_v13 = vadd.f32 %v2444_v43, %v920_v12  ;;  %v959_v14 = vmax.f32 %v929_v10, 0.0  ;;  %v2893_v12 = vld [vmem:[%s3862_s6 + $0x24] ss:$8 sps:$4 sm:$0xff]  }
 0x235   : > { %v2668_v15 = vpop.f32.mrf.mxu1 }
 0x236   : > { %v957_v17 = vmax.f32 %v921_v13, 0.0  ;;  %v969_v21 = vpack.c.bf16 %v959_v14, %v958_v18  ;;  %v942_v25 = vadd.f32 %v2668_v15, %v2444_v43  ;;  %v2891_v13 = vld [vmem:[%s3862_s6 + $0x20] ss:$8 sps:$4 sm:$0xff]   ;;  %v2896_v14 = vld [vmem:[%s3862_s6 + $0x14] ss:$8 sps:$4 sm:$0xff]   ;;  %v3050_v18 = vmov 0  }
 0x237   : > { %v933_v19 = vpop.f32.mrf.mxu1  ;;  %v2894_v15 = vld [vmem:[%s3862_s6 + $0x10] ss:$8 sps:$4 sm:$0xff]  }
 0x238   : > { %v968_v20 = vpack.c.bf16 %v957_v17, %v956_v16  ;;  %v934_v23 = vadd.f32 %v2444_v43, %v933_v19  ;;  %v962_v39 = vmax.f32 %v942_v25, 0.0  ;;  %v2899_v16 = vld [vmem:[%s3862_s6 + $0x4] ss:$8 sps:$4 sm:$0xff]   ;;  %v2897_v17 = vld [vmem:[%s3862_s6] ss:$8 sps:$4 sm:$0xff]  }
 0x239   : > { %v2669_v22 = vpop.f32.mrf.mxu1  ;;  %v3376_v19 = vld [vmem:[%s3861_s5] ss:$0 sm:$0xff] }
 0x23a   : > { %v945_v24 = vadd.f32 %v2669_v22, %v2444_v43  ;;  %2694 = vmatprep.mubr.bf16.mxu1 %v968_v20  ;;  %v960_v34 = vmax.f32 %v934_v23, 0.0 }
 0x23b   : > { %v936_v28 = vpop.f32.mrf.mxu1  ;;  %2695 = vmatmul.mubr.bf16.gmra.mxu1 %v969_v21 }
 0x23c   : > { %v937_v29 = vadd.f32 %v2444_v43, %v936_v28  ;;  %v963_v33 = vmax.f32 %v945_v24, 0.0  ;;  %v2881_v43 = vld [vmem:[%s3862_s6 + $0x64] ss:$8 sps:$4 sm:$0xff]  }
 0x23d   : > { %1367 = vmatprep.subr.bf16.mxu1 %v2881_v43 }
 0x23e   : > { %v961_v38 = vmax.f32 %v937_v29, 0.0  ;;  %v971_v41 = vpack.c.bf16 %v963_v33, %v962_v39  ;;  %1368 = vmatpush1.bf16.msra.mxu1 %v2879_v45 }
 0x23f   : > { %1369 = vmatprep.subr.bf16.mxu1 %v2884_v46 }
 0x240   : > { %v970_v40 = vpack.c.bf16 %v961_v38, %v960_v34 }
 0x242   : > { %2698 = vmatprep.mubr.bf16.mxu1 %v970_v40  ;;  %1370 = vmatpush1.bf16.msra.mxu1 %v2882_v47 }
 0x243   : > { %2699 = vmatmul.mubr.bf16.gmra.mxu1 %v971_v41  ;;  %1371 = vmatprep.subr.bf16.mxu1 %v2887_v48 }
 0x244   : > { %1397 = vmatprep.mubr.bf16.mxu1 %v3050_v18 }
 0x246   : > { %1372 = vmatpush1.bf16.msra.mxu1 %v2885_v49 }
 0x247   : > { %1373 = vmatprep.subr.bf16.mxu1 %v2890_v50 }
 0x24a   : > { %1374 = vmatpush1.bf16.msra.mxu1 %v2888_v51 }
 0x24b   : > { %1375 = vmatprep.subr.bf16.mxu1 %v2893_v12 }
 0x24e   : > { %1376 = vmatpush1.bf16.msra.mxu1 %v2891_v13 }
 0x24f   : > { %1377 = vmatprep.subr.bf16.mxu1 %v2896_v14 }
 0x252   : > { %1378 = vmatpush1.bf16.msra.mxu1 %v2894_v15 }
 0x253   : > { %1379 = vmatprep.subr.bf16.mxu1 %v2899_v16 }
 0x256   : > { %1380 = vmatpush1.bf16.msra.mxu1 %v2897_v17 }
 0x2eb   : > { %v2688_v52 = vpop.f32.mrf.mxu1 }
 0x2ed   : > { %v1070_v53 = vpop.f32.mrf.mxu1 }
 0x2ef   : > { %v2689_v54 = vpop.f32.mrf.mxu1 }
 0x2f0   : > { %v1134_v10 = vpack.c.bf16 %v2689_v54, %v2688_v52 }
 0x2f1   : > { %v1073_v55 = vpop.f32.mrf.mxu1 }
 0x2f2   : > { %v1133_v11 = vpack.c.bf16 %v1073_v55, %v1070_v53 }
 0x2f3   : > { %v2692_v56 = vpop.f32.mrf.mxu1 }
 0x2f5   : > { %v1086_v57 = vpop.f32.mrf.mxu1 }
 0x2f7   : > { %v2693_v58 = vpop.f32.mrf.mxu1 }
 0x2f8   : > { %v1136_v8 = vpack.c.bf16 %v2693_v58, %v2692_v56 }
 0x2f9   : > { %v1089_v59 = vpop.f32.mrf.mxu1 }
 0x2fa   : > { %v1135_v9 = vpack.c.bf16 %v1089_v59, %v1086_v57 }
 0x2fb   : > { %v2696_v60 = vpop.f32.mrf.mxu1 }
 0x2fd   : > { %v1102_v61 = vpop.f32.mrf.mxu1 }
 0x2ff   : > { %v2697_v62 = vpop.f32.mrf.mxu1 }
 0x300   : > { %v1138_v6 = vpack.c.bf16 %v2697_v62, %v2696_v60 }
 0x301   : > { %v1105_v63 = vpop.f32.mrf.mxu1 }
 0x302   : > { %v1137_v7 = vpack.c.bf16 %v1105_v63, %v1102_v61 }
 0x303   : > { %v2700_v0 = vpop.f32.mrf.mxu1 }
 0x305   : > { %v1118_v1 = vpop.f32.mrf.mxu1 }
 0x307   : > { %v2701_v2 = vpop.f32.mrf.mxu1 }
 0x308   : > { %v1140_v3 = vpack.c.bf16 %v2701_v2, %v2700_v0 }
 0x309   : > { %v1121_v4 = vpop.f32.mrf.mxu1 }
 0x30a   : > { %v1139_v5 = vpack.c.bf16 %v1121_v4, %v1118_v1  ;;  %2702 = vmatprep.subr.bf16.mxu0 %v1140_v3 }
 0x30b   : > { %2703 = vmatpush3.bf16.msra.mxu0 %v1140_v3 }
 0x30c   : > { %2704 = vmatprep.subr.bf16.mxu0 %v1139_v5 }
 0x30f   : > { %2705 = vmatpush3.bf16.msra.mxu0 %v1139_v5 }
 0x310   : > { %2706 = vmatprep.subr.bf16.mxu0 %v1138_v6 }
 0x313   : > { %2707 = vmatpush3.bf16.msra.mxu0 %v1138_v6 }
 0x314   : > { %2708 = vmatprep.subr.bf16.mxu0 %v1137_v7 }
 0x317   : > { %2709 = vmatpush3.bf16.msra.mxu0 %v1137_v7 }
 0x318   : > { %2710 = vmatprep.subr.bf16.mxu0 %v1136_v8 }
 0x31b   : > { %2711 = vmatpush3.bf16.msra.mxu0 %v1136_v8 }
 0x31c   : > { %2712 = vmatprep.subr.bf16.mxu0 %v1135_v9 }
 0x31f   : > { %2713 = vmatpush3.bf16.msra.mxu0 %v1135_v9 }
 0x320   : > { %2714 = vmatprep.subr.bf16.mxu0 %v1134_v10 }
 0x323   : > { %2715 = vmatpush3.bf16.msra.mxu0 %v1134_v10 }
 0x324   : > { %2716 = vmatprep.subr.bf16.mxu0 %v1133_v11 }
 0x327   : > { %2717 = vmatpush3.bf16.msra.mxu0 %v1133_v11 }
 0x32a   : > { %2719 = vmatmul.mubr.bf16.vlgmr.msra.gmra.mxu0 %v3261_v26 }
 0x32b   : > { %2722 = vmatprep.mubr.bf16.mxu0 %v3265_v27 }
 0x332   : > { %2723 = vmatmul.mubr.bf16.gmra.mxu0 %v3276_v30 }
 0x333   : > { %2726 = vmatprep.mubr.bf16.mxu0 %v3279_v31 }
 0x33a   : > { %2727 = vmatmul.mubr.bf16.gmra.mxu0 %v3290_v35 }
 0x33b   : > { %2730 = vmatprep.mubr.bf16.mxu0 %v3293_v36 }
 0x342   : > { %2731 = vmatmul.mubr.bf16.gmra.mxu0 %v3298_v37 }
 0x343   : > { %1538 = vmatprep.mubr.bf16.mxu0 %v3050_v18 }
 0x3ea   : > { %v2720_v20 = vpop.f32.mrf.mxu0 }
 0x3eb   : > { %v1191_v21 = vadd.f32 %v2720_v20, %v3376_v19 }
 0x3ec   : > { %v1182_v22 = vpop.f32.mrf.mxu0 }
 0x3ed   : > { %v1247_v23 = vmax.f32 %v1191_v21, 0.0  ;;  %v1183_v24 = vadd.f32 %v3376_v19, %v1182_v22 }
 0x3ee   : > { %v2721_v25 = vpop.f32.mrf.mxu0 }
 0x3ef   : > { %2196 = vst [vmem:[%s3383_s30 + $0x10] sm:$0xff] %v1247_v23  ;;  %v1245_v28 = vmax.f32 %v1183_v24, 0.0  ;;  %v1194_v29 = vadd.f32 %v2721_v25, %v3376_v19 }
 0x3f0   : > { %v1185_v33 = vpop.f32.mrf.mxu0 }
 0x3f1   : > { %2194 = vst [vmem:[%s3383_s30] sm:$0xff] %v1245_v28  ;;  %v1248_v34 = vmax.f32 %v1194_v29, 0.0  ;;  %v1186_v38 = vadd.f32 %v3376_v19, %v1185_v33 }
 0x3f2   : > { %v2724_v39 = vpop.f32.mrf.mxu0 }
 0x3f3   : > { %2197 = vst [vmem:[%s3383_s30 + $0x18] sm:$0xff] %v1248_v34  ;;  %v1246_v40 = vmax.f32 %v1186_v38, 0.0  ;;  %v1207_v41 = vadd.f32 %v2724_v39, %v3376_v19  ;;  %v1262_v56 = vpack.c.bf16 %v1248_v34, %v1247_v23 }
 0x3f4   : > { %v1198_v42 = vpop.f32.mrf.mxu0 }
 0x3f5   : > { %v1261_v44 = vpack.c.bf16 %v1246_v40, %v1245_v28  ;;  %2195 = vst [vmem:[%s3383_s30 + $0x8] sm:$0xff] %v1246_v40  ;;  %v1251_v43 = vmax.f32 %v1207_v41, 0.0  ;;  %v1199_v45 = vadd.f32 %v3376_v19, %v1198_v42 }
 0x3f6   : > { %v2725_v46 = vpop.f32.mrf.mxu0 }
 0x3f7   : > { %2200 = vst [vmem:[%s3383_s30 + $0x30] sm:$0xff] %v1251_v43  ;;  %v1249_v47 = vmax.f32 %v1199_v45, 0.0  ;;  %1398 = vmatmul.mubr.bf16.vlgmr.msra.gmra.mxu1 %v1261_v44  ;;  %v1210_v48 = vadd.f32 %v2725_v46, %v3376_v19  ;;  %v2900_v46 = vld [vmem:[%s3864_s8 + $0x70] ss:$8 sps:$4 sm:$0xff]  }
 0x3f8   : > { %v1201_v49 = vpop.f32.mrf.mxu0  ;;  %1407 = vmatprep.mubr.bf16.mxu1 %v3050_v18 }
 0x3f9   : > { %2198 = vst [vmem:[%s3383_s30 + $0x20] sm:$0xff] %v1249_v47  ;;  %v1252_v50 = vmax.f32 %v1210_v48, 0.0  ;;  %v1202_v51 = vadd.f32 %v3376_v19, %v1201_v49  ;;  %v2905_v49 = vld [vmem:[%s3864_s8 + $0x64] ss:$8 sps:$4 sm:$0xff]  }
 0x3fa   : > { %v2728_v52 = vpop.f32.mrf.mxu0 }
 0x3fb   : > { %2201 = vst [vmem:[%s3383_s30 + $0x38] sm:$0xff] %v1252_v50  ;;  %v1250_v53 = vmax.f32 %v1202_v51, 0.0  ;;  %v1223_v54 = vadd.f32 %v2728_v52, %v3376_v19  ;;  %v1264_v15 = vpack.c.bf16 %v1252_v50, %v1251_v43  ;;  %v2903_v51 = vld [vmem:[%s3864_s8 + $0x60] ss:$8 sps:$4 sm:$0xff]   ;;  %v2908_v52 = vld [vmem:[%s3864_s8 + $0x54] ss:$8 sps:$4 sm:$0xff]  }
 0x3fc   : > { %v1214_v55 = vpop.f32.mrf.mxu0 }
 0x3fd   : > { %2199 = vst [vmem:[%s3383_s30 + $0x28] sm:$0xff] %v1250_v53  ;;  %v1255_v57 = vmax.f32 %v1223_v54, 0.0  ;;  %v1215_v58 = vadd.f32 %v3376_v19, %v1214_v55  ;;  %v1263_v5 = vpack.c.bf16 %v1250_v53, %v1249_v47  ;;  %v2902_v47 = vld [vmem:[%s3864_s8 + $0x74] ss:$8 sps:$4 sm:$0xff]   ;;  %v2906_v55 = vld [vmem:[%s3864_s8 + $0x50] ss:$8 sps:$4 sm:$0xff]  }
 0x3fe   : > { %v2729_v59 = vpop.f32.mrf.mxu0  ;;  %1755 = vmatprep.subr.bf16.mxu1 %v2902_v47 }
 0x3ff   : > { %1408 = vmatmul.mubr.bf16.gmra.mxu1 %v1262_v56  ;;  %2204 = vst [vmem:[%s3383_s30 + $0x50] sm:$0xff] %v1255_v57  ;;  %v1253_v60 = vmax.f32 %v1215_v58, 0.0  ;;  %v1226_v61 = vadd.f32 %v2729_v59, %v3376_v19  ;;  %v2911_v56 = vld [vmem:[%s3864_s8 + $0x44] ss:$8 sps:$4 sm:$0xff]   ;;  %v2909_v59 = vld [vmem:[%s3864_s8 + $0x40] ss:$8 sps:$4 sm:$0xff]  }
 0x400   : > { %1417 = vmatprep.mubr.bf16.mxu1 %v3050_v18  ;;  %v1217_v62 = vpop.f32.mrf.mxu0  ;;  %1756 = vmatpush1.bf16.msra.mxu1 %v2900_v46 }
 0x401   : > { %2202 = vst [vmem:[%s3383_s30 + $0x40] sm:$0xff] %v1253_v60  ;;  %v1256_v63 = vmax.f32 %v1226_v61, 0.0  ;;  %v1218_v0 = vadd.f32 %v3376_v19, %v1217_v62  ;;  %1757 = vmatprep.subr.bf16.mxu1 %v2905_v49 }
 0x402   : > { %v2732_v1 = vpop.f32.mrf.mxu0 }
 0x403   : > { %2205 = vst [vmem:[%s3383_s30 + $0x58] sm:$0xff] %v1256_v63  ;;  %v1254_v2 = vmax.f32 %v1218_v0, 0.0  ;;  %v1239_v3 = vadd.f32 %v2732_v1, %v3376_v19  ;;  %v1266_v17 = vpack.c.bf16 %v1256_v63, %v1255_v57  ;;  %v2912_v63 = vld [vmem:[%s3864_s8 + $0x30] ss:$8 sps:$4 sm:$0xff]   ;;  %v2917_v0 = vld [vmem:[%s3864_s8 + $0x24] ss:$8 sps:$4 sm:$0xff]  }
 0x404   : > { %v1230_v4 = vpop.f32.mrf.mxu0  ;;  %1758 = vmatpush1.bf16.msra.mxu1 %v2903_v51 }
 0x405   : > { %2203 = vst [vmem:[%s3383_s30 + $0x48] sm:$0xff] %v1254_v2  ;;  %v1259_v6 = vmax.f32 %v1239_v3, 0.0  ;;  %v1231_v7 = vadd.f32 %v3376_v19, %v1230_v4  ;;  %v1265_v16 = vpack.c.bf16 %v1254_v2, %v1253_v60  ;;  %1759 = vmatprep.subr.bf16.mxu1 %v2908_v52  ;;  %v2914_v60 = vld [vmem:[%s3864_s8 + $0x34] ss:$8 sps:$4 sm:$0xff]   ;;  %v2915_v3 = vld [vmem:[%s3864_s8 + $0x20] ss:$8 sps:$4 sm:$0xff]  }
 0x406   : > { %v2733_v8 = vpop.f32.mrf.mxu0 }
 0x407   : > { %1418 = vmatmul.mubr.bf16.gmra.mxu1 %v1263_v5  ;;  %2208 = vst [vmem:[%s3383_s30 + $0x70] sm:$0xff] %v1259_v6  ;;  %v1257_v9 = vmax.f32 %v1231_v7, 0.0  ;;  %v1242_v10 = vadd.f32 %v2733_v8, %v3376_v19 }
 0x408   : > { %1427 = vmatprep.mubr.bf16.mxu1 %v3050_v18  ;;  %v1233_v11 = vpop.f32.mrf.mxu0  ;;  %1760 = vmatpush1.bf16.msra.mxu1 %v2906_v55 }
 0x409   : > { %2206 = vst [vmem:[%s3383_s30 + $0x60] sm:$0xff] %v1257_v9  ;;  %v1260_v12 = vmax.f32 %v1242_v10, 0.0  ;;  %v1234_v13 = vadd.f32 %v3376_v19, %v1233_v11  ;;  %1761 = vmatprep.subr.bf16.mxu1 %v2911_v56 }
 0x40b   : > { %2209 = vst [vmem:[%s3383_s30 + $0x78] sm:$0xff] %v1260_v12  ;;  %v1258_v14 = vmax.f32 %v1234_v13, 0.0  ;;  %v1268_v19 = vpack.c.bf16 %v1260_v12, %v1259_v6 }
 0x40c   : > { %1762 = vmatpush1.bf16.msra.mxu1 %v2909_v59 }
 0x40d   : > { %2207 = vst [vmem:[%s3383_s30 + $0x68] sm:$0xff] %v1258_v14  ;;  %v1267_v20 = vpack.c.bf16 %v1258_v14, %v1257_v9  ;;  %1763 = vmatprep.subr.bf16.mxu1 %v2914_v60 }
 0x40f   : > { %1428 = vmatmul.mubr.bf16.gmra.mxu1 %v1264_v15 }
 0x410   : > { %1437 = vmatprep.mubr.bf16.mxu1 %v3050_v18  ;;  %1764 = vmatpush1.bf16.msra.mxu1 %v2912_v63 }
 0x411   : > { %1765 = vmatprep.subr.bf16.mxu1 %v2917_v0 }
 0x414   : > { %1766 = vmatpush1.bf16.msra.mxu1 %v2915_v3 }
 0x417   : > { %1438 = vmatmul.mubr.bf16.gmra.mxu1 %v1265_v16 }
 0x418   : > { %1447 = vmatprep.mubr.bf16.mxu1 %v3050_v18 }
 0x41f   : > { %1448 = vmatmul.mubr.bf16.gmra.mxu1 %v1266_v17 }
 0x420   : > { %1457 = vmatprep.mubr.bf16.mxu1 %v3050_v18 }
 0x427   : > { %1458 = vmatmul.mubr.bf16.gmra.mxu1 %v1267_v20 }
 0x428   : > { %1467 = vmatprep.mubr.bf16.mxu1 %v3050_v18 }
 0x42f   : > { %1468 = vmatmul.mubr.bf16.gmra.mxu1 %v1268_v19 }
 0x430   : > { %1787 = vmatprep.mubr.bf16.mxu1 %v3050_v18 }
 0x4b7   : > { %v3423_v21 = vpop.f32.mrf.mxu1 }
 0x4b9   : > { %v3425_v22 = vpop.f32.mrf.mxu1 }
 0x4bb   : > { %v3427_v23 = vpop.f32.mrf.mxu1 }
 0x4bc   : > { %v1478_v24 = vpack.c.bf16 %v3427_v23, %v3423_v21 }
 0x4bd   : > { %v3431_v25 = vpop.f32.mrf.mxu1 }
 0x4be   : > { %v1479_v28 = vpack.c.bf16 %v3431_v25, %v3425_v22 }
 0x4bf   : > { %v3435_v29 = vpop.f32.mrf.mxu1 }
 0x4c1   : > { %v3437_v33 = vpop.f32.mrf.mxu1 }
 0x4c3   : > { %v3439_v34 = vpop.f32.mrf.mxu1 }
 0x4c4   : > { %v1480_v38 = vpack.c.bf16 %v3439_v34, %v3435_v29 }
 0x4c5   : > { %v3443_v39 = vpop.f32.mrf.mxu1 }
 0x4c6   : > { %v1481_v40 = vpack.c.bf16 %v3443_v39, %v3437_v33 }
 0x4c7   : > { %v3447_v41 = vpop.f32.mrf.mxu1 }
 0x4c9   : > { %v3449_v42 = vpop.f32.mrf.mxu1 }
 0x4cb   : > { %v3451_v44 = vpop.f32.mrf.mxu1 }
 0x4cc   : > { %v1482_v52 = vpack.c.bf16 %v3451_v44, %v3447_v41 }
 0x4cd   : > { %v3453_v43 = vpop.f32.mrf.mxu1 }
 0x4ce   : > { %v1483_v51 = vpack.c.bf16 %v3453_v43, %v3449_v42 }
 0x4cf   : > { %v3455_v45 = vpop.f32.mrf.mxu1 }
 0x4d1   : > { %v1431_v48 = vpop.f32.mrf.mxu1 }
 0x4d3   : > { %v1433_v50 = vpop.f32.mrf.mxu1 }
 0x4d4   : > { %v1484_v49 = vpack.c.bf16 %v1433_v50, %v3455_v45 }
 0x4d5   : > { %v1435_v53 = vpop.f32.mrf.mxu1 }
 0x4d6   : > { %v1485_v47 = vpack.c.bf16 %v1435_v53, %v1431_v48 }
 0x4d7   : > { %v1439_v54 = vpop.f32.mrf.mxu1 }
 0x4d9   : > { %v1441_v57 = vpop.f32.mrf.mxu1 }
 0x4db   : > { %v1443_v58 = vpop.f32.mrf.mxu1 }
 0x4dc   : > { %v1486_v46 = vpack.c.bf16 %v1443_v58, %v1439_v54 }
 0x4dd   : > { %v1445_v61 = vpop.f32.mrf.mxu1 }
 0x4de   : > { %v1487_v19 = vpack.c.bf16 %v1445_v61, %v1441_v57 }
 0x4df   : > { %v1449_v62 = vpop.f32.mrf.mxu1 }
 0x4e1   : > { %v1451_v1 = vpop.f32.mrf.mxu1 }
 0x4e3   : > { %v1453_v2 = vpop.f32.mrf.mxu1 }
 0x4e4   : > { %v1488_v20 = vpack.c.bf16 %v1453_v2, %v1449_v62 }
 0x4e5   : > { %v1455_v4 = vpop.f32.mrf.mxu1 }
 0x4e6   : > { %v1489_v17 = vpack.c.bf16 %v1455_v4, %v1451_v1 }
 0x4e7   : > { %v1459_v5 = vpop.f32.mrf.mxu1 }
 0x4e9   : > { %v1461_v6 = vpop.f32.mrf.mxu1 }
 0x4eb   : > { %v1463_v7 = vpop.f32.mrf.mxu1 }
 0x4ec   : > { %v1490_v16 = vpack.c.bf16 %v1463_v7, %v1459_v5 }
 0x4ed   : > { %v1465_v8 = vpop.f32.mrf.mxu1 }
 0x4ee   : > { %v1491_v15 = vpack.c.bf16 %v1465_v8, %v1461_v6 }
 0x4ef   : > { %v1469_v9 = vpop.f32.mrf.mxu1 }
 0x4f1   : > { %v1471_v10 = vpop.f32.mrf.mxu1 }
 0x4f3   : > { %v1473_v11 = vpop.f32.mrf.mxu1 }
 0x4f4   : > { %v1492_v14 = vpack.c.bf16 %v1473_v11, %v1469_v9 }
 0x4f5   : > { %v1475_v12 = vpop.f32.mrf.mxu1 }
 0x4f6   : > { %v1493_v13 = vpack.c.bf16 %v1475_v12, %v1471_v10 }
 0x4f8   : > { %1506 = vmatprep.subr.bf16.mxu0 %v1493_v13 }
 0x4f9   : > { %1507 = vmatpush1.bf16.msra.mxu0 %v1492_v14 }
 0x4fa   : > { %1508 = vmatprep.subr.bf16.mxu0 %v1491_v15 }
 0x4fd   : > { %1509 = vmatpush1.bf16.msra.mxu0 %v1490_v16 }
 0x4fe   : > { %1510 = vmatprep.subr.bf16.mxu0 %v1489_v17 }
 0x501   : > { %1511 = vmatpush1.bf16.msra.mxu0 %v1488_v20 }
 0x502   : > { %1512 = vmatprep.subr.bf16.mxu0 %v1487_v19 }
 0x505   : > { %1513 = vmatpush1.bf16.msra.mxu0 %v1486_v46 }
 0x506   : > { %1514 = vmatprep.subr.bf16.mxu0 %v1485_v47 }
 0x509   : > { %1515 = vmatpush1.bf16.msra.mxu0 %v1484_v49 }
 0x50a   : > { %1516 = vmatprep.subr.bf16.mxu0 %v1483_v51 }
 0x50d   : > { %1517 = vmatpush1.bf16.msra.mxu0 %v1482_v52 }
 0x50e   : > { %1518 = vmatprep.subr.bf16.mxu0 %v1481_v40 }
 0x511   : > { %1519 = vmatpush1.bf16.msra.mxu0 %v1480_v38 }
 0x512   : > { %1520 = vmatprep.subr.bf16.mxu0 %v1479_v28 }
 0x515   : > { %1521 = vmatpush1.bf16.msra.mxu0 %v1478_v24 }
 0x518   : > { %1539 = vmatmul.mubr.bf16.vlgmr.msra.gmra.mxu0 %v3250_v32  ;;  %v2920_v32 = vld [vmem:[%s3864_s8 + $0x14] ss:$8 sps:$4 sm:$0xff]  }
 0x519   : > { %1548 = vmatprep.mubr.bf16.mxu0 %v3050_v18  ;;  %1767 = vmatprep.subr.bf16.mxu1 %v2920_v32 }
 0x520   : > { %1549 = vmatmul.mubr.bf16.gmra.mxu0 %v3261_v26  ;;  %v2918_v26 = vld [vmem:[%s3864_s8 + $0x10] ss:$8 sps:$4 sm:$0xff]  }
 0x521   : > { %1558 = vmatprep.mubr.bf16.mxu0 %v3050_v18  ;;  %1768 = vmatpush1.bf16.msra.mxu1 %v2918_v26 }
 0x528   : > { %1559 = vmatmul.mubr.bf16.gmra.mxu0 %v3265_v27  ;;  %v2923_v27 = vld [vmem:[%s3864_s8 + $0x4] ss:$8 sps:$4 sm:$0xff]  }
 0x529   : > { %1568 = vmatprep.mubr.bf16.mxu0 %v3050_v18  ;;  %1769 = vmatprep.subr.bf16.mxu1 %v2923_v27 }
 0x530   : > { %1569 = vmatmul.mubr.bf16.gmra.mxu0 %v3276_v30  ;;  %v2921_v30 = vld [vmem:[%s3864_s8] ss:$8 sps:$4 sm:$0xff]  }
 0x531   : > { %1578 = vmatprep.mubr.bf16.mxu0 %v3050_v18  ;;  %1770 = vmatpush1.bf16.msra.mxu1 %v2921_v30 }
 0x538   : > { %1579 = vmatmul.mubr.bf16.gmra.mxu0 %v3279_v31  ;;  %v1496_v31 = vlaneseq }
 0x539   : > { %1588 = vmatprep.mubr.bf16.mxu0 %v3050_v18 }
 0x540   : > { %1589 = vmatmul.mubr.bf16.gmra.mxu0 %v3290_v35  ;;  %v3538_v35 = vshrl.u32 %v1496_v31, 7 }
 0x541   : > { %1598 = vmatprep.mubr.bf16.mxu0 %v3050_v18 }
 0x542   : > { %v1502_v34 = vsub.s32 1, %v3538_v35 }
 0x548   : > { %1599 = vmatmul.mubr.bf16.gmra.mxu0 %v3293_v36  ;;  %v1498_v36 = vsub.s32 0, %v3538_v35 }
 0x549   : > { %1608 = vmatprep.mubr.bf16.mxu0 %v3050_v18 }
 0x550   : > { %1609 = vmatmul.mubr.bf16.gmra.mxu0 %v3298_v37  ;;  %v1494_v37 = vld [vmem:[%s3863_s7] sm:$0x3] }
 0x551   : > { %1928 = vmatprep.mubr.bf16.mxu0 %v3050_v18  ;;  %v3546_v21 = vrot.slane %v1494_v37, %v1498_v36  ;;  %v3557_v42 = vrot.slane %v1494_v37, %v1502_v34 }
 0x5d8   : > { %v1540_v22 = vpop.f32.mrf.mxu0 }
 0x5d9   : > { %v1541_v24 = vadd.f32 %v1540_v22, %v3546_v21 }
 0x5da   : > { %v3548_v23 = vpop.f32.mrf.mxu0 }
 0x5db   : > { %v1619_v33 = vmax.f32 %v1541_v24, 0.0 }
 0x5dc   : > { %v1544_v25 = vpop.f32.mrf.mxu0 }
 0x5dd   : > { %v1545_v28 = vadd.f32 %v1544_v25, %v3546_v21 }
 0x5de   : > { %v3552_v29 = vpop.f32.mrf.mxu0 }
 0x5df   : > { %v1621_v38 = vmax.f32 %v1545_v28, 0.0 }
 0x5e0   : > { %v1550_v39 = vpop.f32.mrf.mxu0 }
 0x5e1   : > { %v1651_v40 = vpack.c.bf16 %v1621_v38, %v1619_v33  ;;  %v1551_v44 = vadd.f32 %v1550_v39, %v3546_v21 }
 0x5e2   : > { %v1552_v41 = vpop.f32.mrf.mxu0 }
 0x5e3   : > { %1788 = vmatmul.mubr.bf16.vlgmr.msra.gmra.mxu1 %v1651_v40  ;;  %v1553_v45 = vadd.f32 %v1552_v41, %v3557_v42  ;;  %v1623_v53 = vmax.f32 %v1551_v44, 0.0 }
 0x5e4   : > { %v1554_v43 = vpop.f32.mrf.mxu0  ;;  %1797 = vmatprep.mubr.bf16.mxu1 %v3050_v18 }
 0x5e5   : > { %v1555_v48 = vadd.f32 %v1554_v43, %v3546_v21  ;;  %v1624_v57 = vmax.f32 %v1553_v45, 0.0 }
 0x5e6   : > { %v1556_v50 = vpop.f32.mrf.mxu0 }
 0x5e7   : > { %v1625_v54 = vmax.f32 %v1555_v48, 0.0  ;;  %v1557_v55 = vadd.f32 %v1556_v50, %v3557_v42 }
 0x5e8   : > { %v1560_v56 = vpop.f32.mrf.mxu0 }
 0x5e9   : > { %v1652_v58 = vpack.c.bf16 %v1625_v54, %v1623_v53  ;;  %v1626_v59 = vmax.f32 %v1557_v55, 0.0  ;;  %v1561_v62 = vadd.f32 %v1560_v56, %v3546_v21  ;;  %v1547_v55 = vadd.f32 %v3552_v29, %v3557_v42 }
 0x5ea   : > { %v1562_v60 = vpop.f32.mrf.mxu0 }
 0x5eb   : > { %v3564_v61 = vpack.c.bf16 %v1626_v59, %v1624_v57  ;;  %1798 = vmatmul.mubr.bf16.gmra.mxu1 %v1652_v58  ;;  %v1563_v0 = vadd.f32 %v1562_v60, %v3557_v42  ;;  %v1627_v3 = vmax.f32 %v1561_v62, 0.0  ;;  %v1543_v58 = vadd.f32 %v3548_v23, %v3557_v42 }
 0x5ec   : > { %v1564_v63 = vpop.f32.mrf.mxu0  ;;  %1807 = vmatprep.mubr.bf16.mxu1 %v3050_v18 }
 0x5ed   : > { %v1565_v1 = vadd.f32 %v1564_v63, %v3546_v21  ;;  %v1628_v7 = vmax.f32 %v1563_v0, 0.0  ;;  %v1622_v0 = vmax.f32 %v1547_v55, 0.0 }
 0x5ee   : > { %v1566_v2 = vpop.f32.mrf.mxu0 }
 0x5ef   : > { %v1629_v4 = vmax.f32 %v1565_v1, 0.0  ;;  %v1567_v5 = vadd.f32 %v1566_v2, %v3557_v42 }
 0x5f0   : > { %v1570_v6 = vpop.f32.mrf.mxu0 }
 0x5f1   : > { %v1653_v8 = vpack.c.bf16 %v1629_v4, %v1627_v3  ;;  %v1630_v9 = vmax.f32 %v1567_v5, 0.0  ;;  %v1571_v12 = vadd.f32 %v1570_v6, %v3546_v21  ;;  %v1620_v5 = vmax.f32 %v1543_v58, 0.0 }
 0x5f2   : > { %v3571_v10 = vpop.f32.mrf.mxu0 }
 0x5f3   : > { %v3573_v11 = vpack.c.bf16 %v1630_v9, %v1628_v7  ;;  %1808 = vmatmul.mubr.bf16.gmra.mxu1 %v1653_v8  ;;  %v1631_v16 = vmax.f32 %v1571_v12, 0.0  ;;  %v2041_v9 = vpack.c.bf16 %v1622_v0, %v1620_v5 }
 0x5f4   : > { %v1574_v13 = vpop.f32.mrf.mxu0  ;;  %1817 = vmatprep.mubr.bf16.mxu1 %v3050_v18 }
 0x5f5   : > { %v1575_v14 = vadd.f32 %v1574_v13, %v3546_v21 }
 0x5f6   : > { %v3578_v15 = vpop.f32.mrf.mxu0 }
 0x5f7   : > { %v1633_v17 = vmax.f32 %v1575_v14, 0.0 }
 0x5f8   : > { %v1580_v20 = vpop.f32.mrf.mxu0 }
 0x5f9   : > { %v1654_v19 = vpack.c.bf16 %v1633_v17, %v1631_v16  ;;  %v1581_v47 = vadd.f32 %v1580_v20, %v3546_v21 }
 0x5fa   : > { %v3580_v46 = vpop.f32.mrf.mxu0 }
 0x5fb   : > { %1818 = vmatmul.mubr.bf16.gmra.mxu1 %v1654_v19  ;;  %v1635_v32 = vmax.f32 %v1581_v47, 0.0 }
 0x5fc   : > { %v1584_v49 = vpop.f32.mrf.mxu0  ;;  %1827 = vmatprep.mubr.bf16.mxu1 %v3050_v18 }
 0x5fd   : > { %v1585_v51 = vadd.f32 %v1584_v49, %v3546_v21  ;;  %v1583_v49 = vadd.f32 %v3580_v46, %v3557_v42 }
 0x5fe   : > { %v1586_v52 = vpop.f32.mrf.mxu0 }
 0x5ff   : > { %v1637_v26 = vmax.f32 %v1585_v51, 0.0  ;;  %v1587_v19 = vadd.f32 %v1586_v52, %v3557_v42 }
 0x600   : > { %v1590_v27 = vpop.f32.mrf.mxu0 }
 0x601   : > { %v1655_v30 = vpack.c.bf16 %v1637_v26, %v1635_v32  ;;  %v1591_v37 = vadd.f32 %v1590_v27, %v3546_v21  ;;  %v1638_v51 = vmax.f32 %v1587_v19, 0.0  ;;  %v1636_v32 = vmax.f32 %v1583_v49, 0.0  ;;  %v2925_v19 = vld [vmem:[%s3229_s23 + $0x8] sm:$0xff]   ;;  %v2927_v49 = vld [vmem:[%s3229_s23 + $0x18] sm:$0xff]  }
 0x602   : > { %v1592_v31 = vpop.f32.mrf.mxu0  ;;  %v1577_v26 = vadd.f32 %v3578_v15, %v3557_v42 }
 0x603   : > { %1828 = vmatmul.mubr.bf16.gmra.mxu1 %v1655_v30  ;;  %v1639_v28 = vmax.f32 %v1591_v37, 0.0  ;;  %v1593_v16 = vadd.f32 %v1592_v31, %v3557_v42  ;;  %v2045_v27 = vpack.c.bf16 %v1638_v51, %v1636_v32  ;;  %v1573_v30 = vadd.f32 %v3571_v10, %v3557_v42 }
 0x604   : > { %v1594_v22 = vpop.f32.mrf.mxu0  ;;  %1837 = vmatprep.mubr.bf16.mxu1 %v3050_v18  ;;  %v1634_v31 = vmax.f32 %v1577_v26, 0.0 }
 0x605   : > { %v1595_v24 = vadd.f32 %v1594_v22, %v3546_v21  ;;  %v1640_v20 = vmax.f32 %v1593_v16, 0.0  ;;  %v1632_v37 = vmax.f32 %v1573_v30, 0.0  ;;  %v2928_v30 = vld [vmem:[%s3229_s23 + $0x20] sm:$0xff]  }
 0x606   : > { %v1596_v25 = vpop.f32.mrf.mxu0 }
 0x607   : > { %v1641_v33 = vmax.f32 %v1595_v24, 0.0  ;;  %v2044_v52 = vpack.c.bf16 %v1634_v31, %v1632_v37 }
 0x608   : > { %v1600_v38 = vpop.f32.mrf.mxu0 }
 0x609   : > { %v1656_v39 = vpack.c.bf16 %v1641_v33, %v1639_v28  ;;  %v1601_v41 = vadd.f32 %v1600_v38, %v3546_v21 }
 0x60a   : > { %v1602_v40 = vpop.f32.mrf.mxu0 }
 0x60b   : > { %1838 = vmatmul.mubr.bf16.gmra.mxu1 %v1656_v39  ;;  %v1643_v48 = vmax.f32 %v1601_v41, 0.0  ;;  %v1603_v29 = vadd.f32 %v1602_v40, %v3557_v42 }
 0x60c   : > { %v1604_v44 = vpop.f32.mrf.mxu0  ;;  %1847 = vmatprep.mubr.bf16.mxu1 %v3050_v18 }
 0x60d   : > { %v1605_v43 = vadd.f32 %v1604_v44, %v3546_v21  ;;  %v1644_v12 = vmax.f32 %v1603_v29, 0.0 }
 0x60e   : > { %v1606_v45 = vpop.f32.mrf.mxu0 }
 0x60f   : > { %v1645_v50 = vmax.f32 %v1605_v43, 0.0  ;;  %v1607_v60 = vadd.f32 %v1606_v45, %v3557_v42 }
 0x610   : > { %v1610_v53 = vpop.f32.mrf.mxu0 }
 0x611   : > { %v1657_v54 = vpack.c.bf16 %v1645_v50, %v1643_v48  ;;  %v1611_v57 = vadd.f32 %v1610_v53, %v3546_v21  ;;  %v1646_v6 = vmax.f32 %v1607_v60, 0.0 }
 0x612   : > { %v1612_v56 = vpop.f32.mrf.mxu0 }
 0x613   : > { %1848 = vmatmul.mubr.bf16.gmra.mxu1 %v1657_v54  ;;  %v1613_v62 = vadd.f32 %v1612_v56, %v3557_v42  ;;  %v1647_v2 = vmax.f32 %v1611_v57, 0.0  ;;  %v2047_v14 = vpack.c.bf16 %v1646_v6, %v1644_v12 }
 0x614   : > { %v1614_v59 = vpop.f32.mrf.mxu0  ;;  %1857 = vmatprep.mubr.bf16.mxu1 %v3050_v18 }
 0x615   : > { %v1615_v63 = vadd.f32 %v1614_v59, %v3546_v21  ;;  %v1648_v23 = vmax.f32 %v1613_v62, 0.0  ;;  %v1597_v21 = vadd.f32 %v1596_v25, %v3557_v42 }
 0x616   : > { %v1616_v1 = vpop.f32.mrf.mxu0 }
 0x617   : > { %v1649_v3 = vmax.f32 %v1615_v63, 0.0  ;;  %v1617_v4 = vadd.f32 %v1616_v1, %v3557_v42  ;;  %v1642_v17 = vmax.f32 %v1597_v21, 0.0 }
 0x619   : > { %v1658_v7 = vpack.c.bf16 %v1649_v3, %v1647_v2  ;;  %v1650_v8 = vmax.f32 %v1617_v4, 0.0  ;;  %v2046_v47 = vpack.c.bf16 %v1642_v17, %v1640_v20  ;;  %v2924_v20 = vld [vmem:[%s3229_s23] sm:$0xff]  }
 0x61b   : > { %v2048_v13 = vpack.c.bf16 %v1650_v8, %v1648_v23  ;;  %1858 = vmatmul.mubr.bf16.gmra.mxu1 %v1658_v7 }
 0x61c   : > { %2750 = vmatprep.mubr.bf16.mxu1 %v2041_v9 }
 0x61d   : > { %2734 = vmatprep.subr.bf16.mxu1 %v2048_v13 }
 0x61e   : > { %2735 = vmatpush3.bf16.xpose.msra.mxu1 %v2048_v13 }
 0x61f   : > { %2736 = vmatprep.subr.bf16.mxu1 %v2047_v14 }
 0x626   : > { %2737 = vmatpush3.bf16.xpose.msra.mxu1 %v2047_v14 }
 0x627   : > { %2738 = vmatprep.subr.bf16.mxu1 %v2046_v47 }
 0x62e   : > { %2739 = vmatpush3.bf16.xpose.msra.mxu1 %v2046_v47 }
 0x62f   : > { %2740 = vmatprep.subr.bf16.mxu1 %v2045_v27 }
 0x636   : > { %2741 = vmatpush3.bf16.xpose.msra.mxu1 %v2045_v27 }
 0x637   : > { %2742 = vmatprep.subr.bf16.mxu1 %v2044_v52 }
 0x63e   : > { %2743 = vmatpush3.bf16.xpose.msra.mxu1 %v2044_v52 }
 0x63f   : > { %2744 = vmatprep.subr.bf16.mxu1 %v3573_v11 }
 0x646   : > { %2745 = vmatpush3.bf16.xpose.msra.mxu1 %v3573_v11 }
 0x647   : > { %2746 = vmatprep.subr.bf16.mxu1 %v3564_v61 }
 0x64e   : > { %2747 = vmatpush3.bf16.xpose.msra.mxu1 %v3564_v61 }
 0x64f   : > { %2748 = vmatprep.subr.bf16.mxu1 %v2041_v9 }
 0x656   : > { %2749 = vmatpush3.bf16.xpose.msra.mxu1 %v2041_v9 }
 0x65d   : > { %2751 = vmatmul.mubr.bf16.vlgmr.msra.gmra.mxu1 %v3564_v61 }
 0x65e   : > { %2754 = vmatprep.mubr.bf16.mxu1 %v3573_v11 }
 0x665   : > { %2755 = vmatmul.mubr.bf16.gmra.mxu1 %v2044_v52 }
 0x666   : > { %2758 = vmatprep.mubr.bf16.mxu1 %v2045_v27 }
 0x66d   : > { %2759 = vmatmul.mubr.bf16.gmra.mxu1 %v2046_v47  ;;  %v2926_v47 = vld [vmem:[%s3229_s23 + $0x10] sm:$0xff]  }
 0x66e   : > { %2762 = vmatprep.mubr.bf16.mxu1 %v2047_v14 }
 0x675   : > { %2763 = vmatmul.mubr.bf16.gmra.mxu1 %v2048_v13 }
 0x6a3   : > { %v3617_v42 = vpop.f32.mrf.mxu1 }
 0x6a5   : > { %v1791_v10 = vpop.f32.mrf.mxu1 }
 0x6a7   : > { %v1793_v15 = vpop.f32.mrf.mxu1 }
 0x6a8   : > { %v1868_v46 = vpack.c.bf16 %v1793_v15, %v3617_v42 }
 0x6a9   : > { %v1795_v22 = vpop.f32.mrf.mxu1 }
 0x6aa   : > { %v1869_v24 = vpack.c.bf16 %v1795_v22, %v1791_v10  ;;  %v2929_v10 = vld [vmem:[%s3229_s23 + $0x28] sm:$0xff]  }
 0x6ab   : > { %v1799_v25 = vpop.f32.mrf.mxu1 }
 0x6ad   : > { %v1801_v28 = vpop.f32.mrf.mxu1 }
 0x6af   : > { %v1803_v33 = vpop.f32.mrf.mxu1 }
 0x6b0   : > { %v1870_v38 = vpack.c.bf16 %v1803_v33, %v1799_v25  ;;  %v2930_v25 = vld [vmem:[%s3229_s23 + $0x30] sm:$0xff]  }
 0x6b1   : > { %v1805_v61 = vpop.f32.mrf.mxu1 }
 0x6b2   : > { %v1871_v39 = vpack.c.bf16 %v1805_v61, %v1801_v28 }
 0x6b3   : > { %v1809_v11 = vpop.f32.mrf.mxu1 }
 0x6b5   : > { %v1811_v40 = vpop.f32.mrf.mxu1 }
 0x6b7   : > { %v1813_v41 = vpop.f32.mrf.mxu1 }
 0x6b8   : > { %v1872_v17 = vpack.c.bf16 %v1813_v41, %v1809_v11 }
 0x6b9   : > { %v1815_v44 = vpop.f32.mrf.mxu1 }
 0x6ba   : > { %v1873_v16 = vpack.c.bf16 %v1815_v44, %v1811_v40 }
 0x6bb   : > { %v1819_v43 = vpop.f32.mrf.mxu1 }
 0x6bd   : > { %v1821_v45 = vpop.f32.mrf.mxu1 }
 0x6bf   : > { %v1823_v48 = vpop.f32.mrf.mxu1 }
 0x6c0   : > { %v1874_v14 = vpack.c.bf16 %v1823_v48, %v1819_v43 }
 0x6c1   : > { %v1825_v50 = vpop.f32.mrf.mxu1 }
 0x6c2   : > { %v1875_v21 = vpack.c.bf16 %v1825_v50, %v1821_v45 }
 0x6c3   : > { %v1829_v53 = vpop.f32.mrf.mxu1 }
 0x6c5   : > { %v1831_v54 = vpop.f32.mrf.mxu1 }
 0x6c7   : > { %v1833_v55 = vpop.f32.mrf.mxu1 }
 0x6c8   : > { %v1876_v13 = vpack.c.bf16 %v1833_v55, %v1829_v53 }
 0x6c9   : > { %v1835_v56 = vpop.f32.mrf.mxu1 }
 0x6ca   : > { %v1877_v12 = vpack.c.bf16 %v1835_v56, %v1831_v54 }
 0x6cb   : > { %v1839_v57 = vpop.f32.mrf.mxu1 }
 0x6cd   : > { %v1841_v58 = vpop.f32.mrf.mxu1 }
 0x6cf   : > { %v1843_v59 = vpop.f32.mrf.mxu1 }
 0x6d0   : > { %v1878_v9 = vpack.c.bf16 %v1843_v59, %v1839_v57 }
 0x6d1   : > { %v1845_v60 = vpop.f32.mrf.mxu1 }
 0x6d2   : > { %v1879_v8 = vpack.c.bf16 %v1845_v60, %v1841_v58 }
 0x6d3   : > { %v1849_v62 = vpop.f32.mrf.mxu1 }
 0x6d5   : > { %v1851_v63 = vpop.f32.mrf.mxu1 }
 0x6d7   : > { %v1853_v0 = vpop.f32.mrf.mxu1 }
 0x6d8   : > { %v1880_v7 = vpack.c.bf16 %v1853_v0, %v1849_v62 }
 0x6d9   : > { %v1855_v1 = vpop.f32.mrf.mxu1 }
 0x6da   : > { %v1881_v23 = vpack.c.bf16 %v1855_v1, %v1851_v63 }
 0x6db   : > { %v1859_v29 = vpop.f32.mrf.mxu1 }
 0x6dd   : > { %v1861_v2 = vpop.f32.mrf.mxu1 }
 0x6df   : > { %v1863_v3 = vpop.f32.mrf.mxu1 }
 0x6e0   : > { %v1882_v6 = vpack.c.bf16 %v1863_v3, %v1859_v29 }
 0x6e1   : > { %v1865_v4 = vpop.f32.mrf.mxu1 }
 0x6e2   : > { %v1883_v5 = vpack.c.bf16 %v1865_v4, %v1861_v2 }
 0x6e4   : > { %1896 = vmatprep.subr.bf16.mxu0 %v1883_v5 }
 0x6e5   : > { %1897 = vmatpush1.bf16.msra.mxu0 %v1882_v6 }
 0x6e6   : > { %1898 = vmatprep.subr.bf16.mxu0 %v1881_v23 }
 0x6e9   : > { %1899 = vmatpush1.bf16.msra.mxu0 %v1880_v7 }
 0x6ea   : > { %1900 = vmatprep.subr.bf16.mxu0 %v1879_v8 }
 0x6ed   : > { %1901 = vmatpush1.bf16.msra.mxu0 %v1878_v9 }
 0x6ee   : > { %1902 = vmatprep.subr.bf16.mxu0 %v1877_v12 }
 0x6f1   : > { %1903 = vmatpush1.bf16.msra.mxu0 %v1876_v13 }
 0x6f2   : > { %1904 = vmatprep.subr.bf16.mxu0 %v1875_v21 }
 0x6f5   : > { %1905 = vmatpush1.bf16.msra.mxu0 %v1874_v14 }
 0x6f6   : > { %1906 = vmatprep.subr.bf16.mxu0 %v1873_v16 }
 0x6f9   : > { %1907 = vmatpush1.bf16.msra.mxu0 %v1872_v17 }
 0x6fa   : > { %1908 = vmatprep.subr.bf16.mxu0 %v1871_v39  ;;  %v2931_v39 = vld [vmem:[%s3229_s23 + $0x38] sm:$0xff]   ;;  %s3051_s23 = smov [#allocation2]  }
 0x6fb   : > { %s2936_s16 = sshll.u32 %s3051_s23, 4  ;;  %s2937_s16 = int_to_ptr.vmem [resolvable:$false] %s2936_s16 }
 0x6fc   : > { %p2939_p0 = scmp.lt.s32.totalorder %s3664_s18, %s2937_s16 }
 0x6fd   : > { %1909 = vmatpush1.bf16.msra.mxu0 %v1870_v38 }
 0x6fe   : > { %1910 = vmatprep.subr.bf16.mxu0 %v1869_v24 }
 0x701   : > { %1911 = vmatpush1.bf16.msra.mxu0 %v1868_v46 }
 0x704   : > { %1929 = vmatmul.mubr.bf16.vlgmr.msra.gmra.mxu0 %v2924_v20 }
 0x705   : > { %1938 = vmatprep.mubr.bf16.mxu0 %v3050_v18 }
 0x70c   : > { %1939 = vmatmul.mubr.bf16.gmra.mxu0 %v2925_v19 }
 0x70d   : > { %1948 = vmatprep.mubr.bf16.mxu0 %v3050_v18 }
 0x714   : > { %1949 = vmatmul.mubr.bf16.gmra.mxu0 %v2926_v47 }
 0x715   : > { %1958 = vmatprep.mubr.bf16.mxu0 %v3050_v18 }
 0x71c   : > { %1959 = vmatmul.mubr.bf16.gmra.mxu0 %v2927_v49 }
 0x71d   : > { %v2752_v51 = vpop.f32.mrf.mxu1  ;;  %1968 = vmatprep.mubr.bf16.mxu0 %v3050_v18 }
 0x71e   : > { %2148 = vst [vmem:[%s3630_s15 + $0x10] sm:$0xff] %v2752_v51 }
 0x71f   : > { %v2083_v32 = vpop.f32.mrf.mxu1 }
 0x720   : > { %2146 = vst [vmem:[%s3630_s15] sm:$0xff] %v2083_v32 }
 0x721   : > { %v2753_v26 = vpop.f32.mrf.mxu1 }
 0x722   : > { %2149 = vst [vmem:[%s3630_s15 + $0x18] sm:$0xff] %v2753_v26 }
 0x723   : > { %v2086_v27 = vpop.f32.mrf.mxu1 }
 0x724   : > { %2147 = vst [vmem:[%s3630_s15 + $0x8] sm:$0xff] %v2086_v27  ;;  %1969 = vmatmul.mubr.bf16.gmra.mxu0 %v2928_v30 }
 0x725   : > { %v2756_v31 = vpop.f32.mrf.mxu1  ;;  %1978 = vmatprep.mubr.bf16.mxu0 %v3050_v18 }
 0x726   : > { %2152 = vst [vmem:[%s3630_s15 + $0x30] sm:$0xff] %v2756_v31 }
 0x727   : > { %v2099_v37 = vpop.f32.mrf.mxu1 }
 0x728   : > { %2150 = vst [vmem:[%s3630_s15 + $0x20] sm:$0xff] %v2099_v37 }
 0x729   : > { %v2757_v52 = vpop.f32.mrf.mxu1 }
 0x72a   : > { %2153 = vst [vmem:[%s3630_s15 + $0x38] sm:$0xff] %v2757_v52 }
 0x72b   : > { %v2102_v42 = vpop.f32.mrf.mxu1 }
 0x72c   : > { %2151 = vst [vmem:[%s3630_s15 + $0x28] sm:$0xff] %v2102_v42  ;;  %1979 = vmatmul.mubr.bf16.gmra.mxu0 %v2929_v10 }
 0x72d   : > { %v2760_v15 = vpop.f32.mrf.mxu1  ;;  %1988 = vmatprep.mubr.bf16.mxu0 %v3050_v18 }
 0x72e   : > { %2156 = vst [vmem:[%s3630_s15 + $0x50] sm:$0xff] %v2760_v15 }
 0x72f   : > { %v2115_v46 = vpop.f32.mrf.mxu1 }
 0x730   : > { %2154 = vst [vmem:[%s3630_s15 + $0x40] sm:$0xff] %v2115_v46 }
 0x731   : > { %v2761_v22 = vpop.f32.mrf.mxu1 }
 0x732   : > { %2157 = vst [vmem:[%s3630_s15 + $0x58] sm:$0xff] %v2761_v22 }
 0x733   : > { %v2118_v24 = vpop.f32.mrf.mxu1 }
 0x734   : > { %2155 = vst [vmem:[%s3630_s15 + $0x48] sm:$0xff] %v2118_v24  ;;  %1989 = vmatmul.mubr.bf16.gmra.mxu0 %v2930_v25 }
 0x735   : > { %v2764_v28 = vpop.f32.mrf.mxu1  ;;  %1998 = vmatprep.mubr.bf16.mxu0 %v3050_v18 }
 0x736   : > { %2160 = vst [vmem:[%s3630_s15 + $0x70] sm:$0xff] %v2764_v28 }
 0x737   : > { %v2131_v33 = vpop.f32.mrf.mxu1 }
 0x738   : > { %2158 = vst [vmem:[%s3630_s15 + $0x60] sm:$0xff] %v2131_v33 }
 0x739   : > { %v2765_v38 = vpop.f32.mrf.mxu1 }
 0x73a   : > { %2161 = vst [vmem:[%s3630_s15 + $0x78] sm:$0xff] %v2765_v38 }
 0x73b   : > { %v2134_v61 = vpop.f32.mrf.mxu1 }
 0x73c   : > { %2159 = vst [vmem:[%s3630_s15 + $0x68] sm:$0xff] %v2134_v61  ;;  %1999 = vmatmul.mubr.bf16.gmra.mxu0 %v2931_v39  ;;  %s2938_s15 = scalar_lea.vmem %s2937_s16, 4096 }
 0x73d   : > { %p2940_p1 = scmp.lt.s32.totalorder %s2938_s15, %s2932_s29 }
 0x73f   : > { %p2941_p2 = por %p2940_p1, %p2939_p0 }
 0x741   : > { %p2942_p3 = pnand %p2941_p2, %p2935_p13 }
 0x743   : > { %2945 = shalt.err (!%p2942_p3)
}
 0x744   : > { %s2946_s17 = scalar_lea.hbm %s3662_s19, 2048  ;;  %s2950_s23 = scalar_lea.hbm %s3866_s10, 4096 }
 0x745   : > { %p2947_p4 = scmp.ne.s32.totalorder %s3662_s19, %s2946_s17  ;;  %p2951_p9 = scmp.lt.s32.totalorder %s3662_s19, %s3866_s10 }
 0x746   : > { %p2952_p10 = scmp.lt.s32.totalorder %s2950_s23, %s2946_s17 }
 0x747   : > { %p2948_p7 = pnand %p2947_p4, %p3163_p5 }
 0x748   : > { %p2953_p11 = por %p2952_p10, %p2951_p9 }
 0x749   : > { %p2949_p8 = pneg %p2948_p7 }
 0x74b   : > { %p2954_p12 = pnand %p2953_p11, %p2949_p8 }
 0x74d   : > { %2957 = shalt.err (!%p2954_p12)
}
 0x74e   : > { %s3873_s29 = smov 128   ;;  %s3874_s16 = smov 8   ;;  %v1884_v18 = vld [vmem:[%s3865_s9] sm:$0x3] }
 0x74f   : > { %s3884_s0 = scalar_lea.sflag [#allocation3], %s3371_s28  ;;  %v3697_v11 = vrot.slane %v1884_v18, %v1498_v36  ;;  %s2406_s20 = sshll.u32 %s3371_s28, 8  ;;  %v3702_v40 = vrot.slane %v1884_v18, %v1502_v34 }
 0x750   : > { %2766 = dma.vmem_to_hbm [thread:$0]  (%p3163_p5), %s3664_s18, 2048, %s3662_s19, %s3884_s0, %s3873_s29, %s3873_s29, %s3874_s16  }
 0x751   : > { %s3706_s18 = scalar_lea.vmem [#allocation4], %s2406_s20  ;;  %s2215_s28 = sand.u32 1, %s3144_s25  }
 0x752   : > { %s2508_s19 = sshll.u32 %s3144_s25, 12  ;;  %s2250_s17 = sshll.u32 %s3706_s18, 4  ;;  %s3778_s17 = int_to_ptr.vmem [resolvable:$true] %s2250_s17 }
 0x753   : > { %s2266_s26 = sshll.u32 %s3383_s30, 4  ;;  %s3775_s15 = scalar_lea.hbm %s3867_s11, %s2508_s19  ;;  %s3787_s26 = int_to_ptr.vmem [resolvable:$true] %s2266_s26 }
 0x754   : > { %s3885_s1 = sshll.u32 %s3144_s25, 11  ;;  %s3790_s30 = scalar_lea.sflag [#allocation5], %s2215_s28 }
 0x755   : > { %s3785_s16 = scalar_lea.hbm %s3868_s12, %s3885_s1  ;;  %s2958_s19 = scalar_lea.vmem %s3778_s17, 4096 }
 0x756   : > { %p2959_p13 = scmp.ne.s32.totalorder %s3778_s17, %s2958_s19  ;;  %s3054_s23 = smov [#allocation4]  }
 0x757   : > { %s2962_s25 = sshll.u32 %s3054_s23, 4  ;;  %s2963_s25 = int_to_ptr.vmem [resolvable:$false] %s2962_s25 }
 0x758   : > { %p2960_p0 = pnand %p2959_p13, %p3163_p5  ;;  %s2964_s0 = scalar_lea.vmem %s2963_s25, 8192 }
 0x759   : > { %p2965_p2 = scmp.lt.s32.totalorder %s3778_s17, %s2963_s25  ;;  %p2966_p3 = scmp.lt.s32.totalorder %s2964_s0, %s2958_s19 }
 0x75a   : > { %p2961_p1 = pneg %p2960_p0 }
 0x75b   : > { %p2967_p4 = por %p2966_p3, %p2965_p2 }
 0x75d   : > { %p2968_p7 = pnand %p2967_p4, %p2961_p1 }
 0x7c4   : > { %v1930_v41 = vpop.f32.mrf.mxu0 }
 0x7c5   : > { %v1931_v44 = vadd.f32 %v1930_v41, %v3697_v11 }
 0x7c6   : > { %v1932_v43 = vpop.f32.mrf.mxu0 }
 0x7c7   : > { %v2009_v45 = vmax.f32 %v1931_v44, 0.0  ;;  %v1933_v48 = vadd.f32 %v1932_v43, %v3702_v40 }
 0x7c8   : > { %v1934_v50 = vpop.f32.mrf.mxu0 }
 0x7c9   : > { %2162 = vst [vmem:[%s3706_s18] sm:$0xff] %v2009_v45  ;;  %v2010_v36 = vmax.f32 %v1933_v48, 0.0  ;;  %v1935_v35 = vadd.f32 %v1934_v50, %v3697_v11 }
 0x7ca   : > { %v1936_v34 = vpop.f32.mrf.mxu0 }
 0x7cb   : > { %2163 = vst [vmem:[%s3706_s18 + $0x8] sm:$0xff] %v2010_v36  ;;  %v2011_v53 = vmax.f32 %v1935_v35, 0.0  ;;  %v1937_v54 = vadd.f32 %v1936_v34, %v3702_v40 }
 0x7cc   : > { %v1940_v55 = vpop.f32.mrf.mxu0 }
 0x7cd   : > { %2164 = vst [vmem:[%s3706_s18 + $0x10] sm:$0xff] %v2011_v53  ;;  %v2012_v56 = vmax.f32 %v1937_v54, 0.0  ;;  %v1941_v57 = vadd.f32 %v1940_v55, %v3697_v11 }
 0x7ce   : > { %v1942_v58 = vpop.f32.mrf.mxu0 }
 0x7cf   : > { %2165 = vst [vmem:[%s3706_s18 + $0x18] sm:$0xff] %v2012_v56  ;;  %v2013_v59 = vmax.f32 %v1941_v57, 0.0  ;;  %v1943_v60 = vadd.f32 %v1942_v58, %v3702_v40 }
 0x7d0   : > { %v1944_v62 = vpop.f32.mrf.mxu0 }
 0x7d1   : > { %2166 = vst [vmem:[%s3706_s18 + $0x20] sm:$0xff] %v2013_v59  ;;  %v2014_v63 = vmax.f32 %v1943_v60, 0.0  ;;  %v1945_v0 = vadd.f32 %v1944_v62, %v3697_v11 }
 0x7d2   : > { %v1946_v1 = vpop.f32.mrf.mxu0 }
 0x7d3   : > { %2167 = vst [vmem:[%s3706_s18 + $0x28] sm:$0xff] %v2014_v63  ;;  %v2015_v29 = vmax.f32 %v1945_v0, 0.0  ;;  %v1947_v2 = vadd.f32 %v1946_v1, %v3702_v40 }
 0x7d4   : > { %v1950_v3 = vpop.f32.mrf.mxu0 }
 0x7d5   : > { %2168 = vst [vmem:[%s3706_s18 + $0x30] sm:$0xff] %v2015_v29  ;;  %v2016_v4 = vmax.f32 %v1947_v2, 0.0  ;;  %v1951_v5 = vadd.f32 %v1950_v3, %v3697_v11 }
 0x7d6   : > { %v1952_v6 = vpop.f32.mrf.mxu0 }
 0x7d7   : > { %2169 = vst [vmem:[%s3706_s18 + $0x38] sm:$0xff] %v2016_v4  ;;  %v2017_v23 = vmax.f32 %v1951_v5, 0.0  ;;  %v1953_v7 = vadd.f32 %v1952_v6, %v3702_v40 }
 0x7d8   : > { %v1954_v8 = vpop.f32.mrf.mxu0 }
 0x7d9   : > { %2170 = vst [vmem:[%s3706_s18 + $0x40] sm:$0xff] %v2017_v23  ;;  %v2018_v9 = vmax.f32 %v1953_v7, 0.0  ;;  %v1955_v12 = vadd.f32 %v1954_v8, %v3697_v11 }
 0x7da   : > { %v1956_v13 = vpop.f32.mrf.mxu0 }
 0x7db   : > { %2171 = vst [vmem:[%s3706_s18 + $0x48] sm:$0xff] %v2018_v9  ;;  %v2019_v21 = vmax.f32 %v1955_v12, 0.0  ;;  %v1957_v14 = vadd.f32 %v1956_v13, %v3702_v40 }
 0x7dc   : > { %v1960_v16 = vpop.f32.mrf.mxu0 }
 0x7dd   : > { %2172 = vst [vmem:[%s3706_s18 + $0x50] sm:$0xff] %v2019_v21  ;;  %v2020_v17 = vmax.f32 %v1957_v14, 0.0  ;;  %v1961_v20 = vadd.f32 %v1960_v16, %v3697_v11 }
 0x7de   : > { %v1962_v19 = vpop.f32.mrf.mxu0 }
 0x7df   : > { %2173 = vst [vmem:[%s3706_s18 + $0x58] sm:$0xff] %v2020_v17  ;;  %v2021_v47 = vmax.f32 %v1961_v20, 0.0  ;;  %v1963_v49 = vadd.f32 %v1962_v19, %v3702_v40 }
 0x7e0   : > { %v1964_v51 = vpop.f32.mrf.mxu0 }
 0x7e1   : > { %2174 = vst [vmem:[%s3706_s18 + $0x60] sm:$0xff] %v2021_v47  ;;  %v2022_v32 = vmax.f32 %v1963_v49, 0.0  ;;  %v1965_v26 = vadd.f32 %v1964_v51, %v3697_v11 }
 0x7e2   : > { %v1966_v27 = vpop.f32.mrf.mxu0 }
 0x7e3   : > { %2175 = vst [vmem:[%s3706_s18 + $0x68] sm:$0xff] %v2022_v32  ;;  %v2023_v30 = vmax.f32 %v1965_v26, 0.0  ;;  %v1967_v31 = vadd.f32 %v1966_v27, %v3702_v40 }
 0x7e4   : > { %v1970_v37 = vpop.f32.mrf.mxu0 }
 0x7e5   : > { %2176 = vst [vmem:[%s3706_s18 + $0x70] sm:$0xff] %v2023_v30  ;;  %v2024_v52 = vmax.f32 %v1967_v31, 0.0  ;;  %v1971_v42 = vadd.f32 %v1970_v37, %v3697_v11 }
 0x7e6   : > { %v1972_v10 = vpop.f32.mrf.mxu0 }
 0x7e7   : > { %2177 = vst [vmem:[%s3706_s18 + $0x78] sm:$0xff] %v2024_v52  ;;  %v2025_v15 = vmax.f32 %v1971_v42, 0.0  ;;  %v1973_v46 = vadd.f32 %v1972_v10, %v3702_v40 }
 0x7e8   : > { %v1974_v22 = vpop.f32.mrf.mxu0 }
 0x7e9   : > { %2178 = vst [vmem:[%s3706_s18 + $0x80] sm:$0xff] %v2025_v15  ;;  %v2026_v24 = vmax.f32 %v1973_v46, 0.0  ;;  %v1975_v25 = vadd.f32 %v1974_v22, %v3697_v11 }
 0x7ea   : > { %v1976_v28 = vpop.f32.mrf.mxu0 }
 0x7eb   : > { %2179 = vst [vmem:[%s3706_s18 + $0x88] sm:$0xff] %v2026_v24  ;;  %v2027_v33 = vmax.f32 %v1975_v25, 0.0  ;;  %v1977_v38 = vadd.f32 %v1976_v28, %v3702_v40 }
 0x7ec   : > { %v1980_v61 = vpop.f32.mrf.mxu0 }
 0x7ed   : > { %2180 = vst [vmem:[%s3706_s18 + $0x90] sm:$0xff] %v2027_v33  ;;  %v2028_v39 = vmax.f32 %v1977_v38, 0.0  ;;  %v1981_v18 = vadd.f32 %v1980_v61, %v3697_v11 }
 0x7ee   : > { %v1982_v41 = vpop.f32.mrf.mxu0 }
 0x7ef   : > { %2181 = vst [vmem:[%s3706_s18 + $0x98] sm:$0xff] %v2028_v39  ;;  %v2029_v44 = vmax.f32 %v1981_v18, 0.0  ;;  %v1983_v43 = vadd.f32 %v1982_v41, %v3702_v40 }
 0x7f0   : > { %v1984_v45 = vpop.f32.mrf.mxu0 }
 0x7f1   : > { %2182 = vst [vmem:[%s3706_s18 + $0xa0] sm:$0xff] %v2029_v44  ;;  %v2030_v48 = vmax.f32 %v1983_v43, 0.0  ;;  %v1985_v50 = vadd.f32 %v1984_v45, %v3697_v11 }
 0x7f2   : > { %v1986_v36 = vpop.f32.mrf.mxu0 }
 0x7f3   : > { %2183 = vst [vmem:[%s3706_s18 + $0xa8] sm:$0xff] %v2030_v48  ;;  %v2031_v35 = vmax.f32 %v1985_v50, 0.0  ;;  %v1987_v34 = vadd.f32 %v1986_v36, %v3702_v40 }
 0x7f4   : > { %v1990_v53 = vpop.f32.mrf.mxu0 }
 0x7f5   : > { %2184 = vst [vmem:[%s3706_s18 + $0xb0] sm:$0xff] %v2031_v35  ;;  %v2032_v54 = vmax.f32 %v1987_v34, 0.0  ;;  %v1991_v55 = vadd.f32 %v1990_v53, %v3697_v11 }
 0x7f6   : > { %v1992_v56 = vpop.f32.mrf.mxu0 }
 0x7f7   : > { %2185 = vst [vmem:[%s3706_s18 + $0xb8] sm:$0xff] %v2032_v54  ;;  %v2033_v57 = vmax.f32 %v1991_v55, 0.0  ;;  %v1993_v58 = vadd.f32 %v1992_v56, %v3702_v40 }
 0x7f8   : > { %v1994_v59 = vpop.f32.mrf.mxu0 }
 0x7f9   : > { %2186 = vst [vmem:[%s3706_s18 + $0xc0] sm:$0xff] %v2033_v57  ;;  %v2034_v60 = vmax.f32 %v1993_v58, 0.0  ;;  %v1995_v62 = vadd.f32 %v1994_v59, %v3697_v11 }
 0x7fa   : > { %v1996_v63 = vpop.f32.mrf.mxu0 }
 0x7fb   : > { %2187 = vst [vmem:[%s3706_s18 + $0xc8] sm:$0xff] %v2034_v60  ;;  %v2035_v0 = vmax.f32 %v1995_v62, 0.0  ;;  %v1997_v1 = vadd.f32 %v1996_v63, %v3702_v40 }
 0x7fc   : > { %v2000_v29 = vpop.f32.mrf.mxu0 }
 0x7fd   : > { %2188 = vst [vmem:[%s3706_s18 + $0xd0] sm:$0xff] %v2035_v0  ;;  %v2036_v2 = vmax.f32 %v1997_v1, 0.0  ;;  %v2001_v3 = vadd.f32 %v2000_v29, %v3697_v11 }
 0x7fe   : > { %v2002_v4 = vpop.f32.mrf.mxu0 }
 0x7ff   : > { %2189 = vst [vmem:[%s3706_s18 + $0xd8] sm:$0xff] %v2036_v2  ;;  %v2037_v5 = vmax.f32 %v2001_v3, 0.0  ;;  %v2003_v6 = vadd.f32 %v2002_v4, %v3702_v40 }
 0x800   : > { %v2004_v23 = vpop.f32.mrf.mxu0 }
 0x801   : > { %2190 = vst [vmem:[%s3706_s18 + $0xe0] sm:$0xff] %v2037_v5  ;;  %v2038_v7 = vmax.f32 %v2003_v6, 0.0  ;;  %v2005_v8 = vadd.f32 %v2004_v23, %v3697_v11 }
 0x802   : > { %v2006_v9 = vpop.f32.mrf.mxu0 }
 0x803   : > { %2191 = vst [vmem:[%s3706_s18 + $0xe8] sm:$0xff] %v2038_v7  ;;  %v2039_v12 = vmax.f32 %v2005_v8, 0.0  ;;  %v2007_v13 = vadd.f32 %v2006_v9, %v3702_v40 }
 0x805   : > { %2192 = vst [vmem:[%s3706_s18 + $0xf0] sm:$0xff] %v2039_v12  ;;  %v2040_v21 = vmax.f32 %v2007_v13, 0.0 }
 0x807   : > { %2193 = vst [vmem:[%s3706_s18 + $0xf8] sm:$0xff] %v2040_v21 }
 0x808   : > { %2971 = shalt.err (!%p2968_p7)
}
 0x809   : > { %s2972_s29 = scalar_lea.hbm %s3775_s15, 4096  ;;  %s2976_s1 = scalar_lea.hbm %s3867_s11, 8192 }
 0x80a   : > { %p2973_p8 = scmp.ne.s32.totalorder %s3775_s15, %s2972_s29  ;;  %p2977_p11 = scmp.lt.s32.totalorder %s3775_s15, %s3867_s11 }
 0x80b   : > { %p2978_p12 = scmp.lt.s32.totalorder %s2976_s1, %s2972_s29 }
 0x80c   : > { %p2974_p9 = pnand %p2973_p8, %p3163_p5 }
 0x80d   : > { %p2979_p13 = por %p2978_p12, %p2977_p11 }
 0x80e   : > { %p2975_p10 = pneg %p2974_p9 }
 0x810   : > { %p2980_p0 = pnand %p2979_p13, %p2975_p10 }
 0x812   : > { %2983 = shalt.err (!%p2980_p0)
}
 0x813   : > { %s3055_s19 = smov 256   ;;  %s3056_s25 = smov 16  }
 0x814   : > { %2767 = dma.vmem_to_hbm [thread:$0]  (%p3163_p5), %s3778_s17, 4096, %s3775_s15, %s3790_s30, %s3055_s19, %s3055_s19, %s3056_s25  }
 0x815   : > { %s2984_s0 = scalar_lea.vmem %s3787_s26, 2048  ;;  %s3057_s29 = smov [#allocation6]  }
 0x816   : > { %p2985_p1 = scmp.ne.s32.totalorder %s3787_s26, %s2984_s0  ;;  %s2988_s18 = sshll.u32 %s3057_s29, 4  ;;  %s2989_s18 = int_to_ptr.vmem [resolvable:$false] %s2988_s18 }
 0x817   : > { %s2990_s28 = scalar_lea.vmem %s2989_s18, 4096  ;;  %p2991_p4 = scmp.lt.s32.totalorder %s3787_s26, %s2989_s18 }
 0x818   : > { %p2986_p2 = pnand %p2985_p1, %p3163_p5  ;;  %p2992_p7 = scmp.lt.s32.totalorder %s2990_s28, %s2984_s0 }
 0x81a   : > { %p2987_p3 = pneg %p2986_p2  ;;  %p2993_p8 = por %p2992_p7, %p2991_p4 }
 0x81c   : > { %p2994_p9 = pnand %p2993_p8, %p2987_p3 }
 0x81e   : > { %2997 = shalt.err (!%p2994_p9)
}
 0x81f   : > { %s2998_s1 = scalar_lea.hbm %s3785_s16, 2048  ;;  %s3002_s20 = scalar_lea.hbm %s3868_s12, 4096 }
 0x820   : > { %p2999_p10 = scmp.ne.s32.totalorder %s3785_s16, %s2998_s1  ;;  %p3003_p13 = scmp.lt.s32.totalorder %s3785_s16, %s3868_s12 }
 0x821   : > { %p3004_p0 = scmp.lt.s32.totalorder %s3002_s20, %s2998_s1 }
 0x822   : > { %p3000_p11 = pnand %p2999_p10, %p3163_p5 }
 0x823   : > { %p3005_p1 = por %p3004_p0, %p3003_p13 }
 0x824   : > { %p3001_p12 = pneg %p3000_p11 }
 0x826   : > { %p3006_p2 = pnand %p3005_p1, %p3001_p12 }
 0x828   : > { %3009 = shalt.err (!%p3006_p2)
}
 0x829   : > { %s3886_s25 = smov 8   ;;  %s3887_s0 = smov 128  }
 0x82a   : > { %2768 = dma.vmem_to_hbm [thread:$0]  (%p3163_p5), %s3787_s26, 2048, %s3785_s16, %s3790_s30, %s3887_s0, %s3887_s0, %s3886_s25  }
 0x82b PF: > { %p2782_p3 = scmp.ge.s32.totalorder %s3048_s24, 2  ;;  %s2281_s29 = sand.u32 1, %s3036_s21  }
 0x82c   : > { %s2282_s18 = scalar_lea.sflag [#allocation3], %s2281_s29 }
 0x82d   : > { %p2773_p4 = pnand %p2782_p3, %p3167_p6 }
 0x82f   : > { %p2774_p7 = pneg %p2773_p4 }
 0x831   : > { %3027 = dma.done.wait (%p2774_p7), %s2282_s18, 2048  }
 0x832   : > { %3029 = vsyncadd (%p2774_p7), %s2282_s18, 4294965248  ;;  %s3888_s13 = sadd.s32 4294967294, %s3048_s24  }
 0x833   : > { %s2290_s28 = sand.u32 1, %s3888_s13  }
 0x834   : > { %s2291_s1 = scalar_lea.sflag [#allocation5], %s2290_s28 }
 0x835   : > { %3031 = dma.done.wait (%p2774_p7), %s2291_s1, 6144  }
 0x836   : > { %3033 = vsyncadd (%p2774_p7), %s2291_s1, 4294961152  ;;  %s3889_s16 = sld [smem:[#allocation9_spill]]  ;;  %p26_p5 = scmp.ge.s32.totalorder %s3148_s27, 4  }
 0x837   : > { %s3890_s23 = sld [smem:[#allocation10_spill]]  ;;  %s3891_s21 = smov %s3040_s22 }
 0x838   : > { %s3893_s24 = smov %s3148_s27  ;;  %28 = sbr.rel (!%p26_p5) target bundleno = 8 (0x8), region = 130 }
 0x83c   : > { %s3892_s22 = smov %s3889_s16 }
 0x83d   :  { %2305 = vsyncpa [#allocation3], 1 }
 0x83e   :  { %2307 = vsyncpa [#allocation3 + $0x1], 1 }
 0x83f   :  { %2308 = vsyncpa [#allocation5], 1 }
 0x840   :  { %2310 = vsyncpa [#allocation5 + $0x1], 1 }

</bundles_post_ra>
